<compile_context>
chip_gen: v5e
topology: v5e:2x2
jax: 0.10.0
libtpu: 0.0.40
codegen_flags: <defaults>
</compile_context>

<pallas_src>
import functools

import jax
import jax.numpy as jnp
from jax.experimental import pallas as pl
from jax.experimental.pallas import tpu as pltpu


# ------------------------------ fused encoder kernel ------------------------------ #

def _encoder_kernel(x_ref,
                    wq_ref, wk_ref, wv_ref, bq_ref, bk_ref, bv_ref,
                    wo_ref, bo_ref, g1_ref, be1_ref,
                    w1_ref, b1_ref, w2_ref, b2_ref, g2_ref, be2_ref,
                    o_ref, *, num_layers, num_heads, head_dim, eps):
    """One grid step = one batch element; the full L-layer encoder runs in-register."""
    x = x_ref[0].astype(jnp.float32)                      # [S, D]
    scale = 1.0 / (head_dim ** 0.5)

    def layer_norm(y, g, b):
        mu = jnp.mean(y, axis=-1, keepdims=True)
        var = jnp.mean(jnp.square(y - mu), axis=-1, keepdims=True)
        return (y - mu) * jax.lax.rsqrt(var + eps) * g + b

    for l in range(num_layers):                           # static unroll (L is small)
        # -------- multi-head self-attention; out-proj folded into the head loop --------
        attn = jnp.zeros(x.shape, jnp.float32)            # [S, D]
        for h in range(num_heads):                        # static unroll (H is small)
            q = jnp.dot(x, wq_ref[l, h], preferred_element_type=jnp.float32) + bq_ref[l, h]
            k = jnp.dot(x, wk_ref[l, h], preferred_element_type=jnp.float32) + bk_ref[l, h]
            v = jnp.dot(x, wv_ref[l, h], preferred_element_type=jnp.float32) + bv_ref[l, h]
            # scores: contract over head_dim without an explicit transpose
            s = jax.lax.dot_general(q, k, (((1,), (1,)), ((), ())),
                                    preferred_element_type=jnp.float32) * scale   # [S, S]
            s = s - jnp.max(s, axis=-1, keepdims=True)
            p = jnp.exp(s)
            p = p / jnp.sum(p, axis=-1, keepdims=True)    # exact softmax
            o_h = jnp.dot(p, v, preferred_element_type=jnp.float32)               # [S, hd]
            # concat(o_h over heads) @ W_out  ==  sum_h  o_h @ W_out[h*hd:(h+1)*hd, :]
            attn = attn + jnp.dot(o_h, wo_ref[l, h], preferred_element_type=jnp.float32)
        y = x + attn + bo_ref[l]
        x = layer_norm(y, g1_ref[l], be1_ref[l])

        # -------- feed-forward; the [S, 4D] hidden never leaves VMEM/vregs --------
        hid = jnp.dot(x, w1_ref[l], preferred_element_type=jnp.float32) + b1_ref[l]
        hid = jnp.maximum(hid, 0.0)
        z = jnp.dot(hid, w2_ref[l], preferred_element_type=jnp.float32) + b2_ref[l]
        x = layer_norm(x + z, g2_ref[l], be2_ref[l])

    o_ref[0] = x.astype(o_ref.dtype)


_WEIGHT_ORDER = ["wq", "wk", "wv", "bq", "bk", "bv", "wo", "bo", "g1", "be1",
                 "w1", "b1", "w2", "b2", "g2", "be2"]


def fused_transformer_encoder(x, stacked, num_heads, *, eps=1e-5):
    """x: [B, S, D]; stacked: dict of layer-stacked, head-split weights (see below)."""
    B, S, D = x.shape
    L, H, _, hd = stacked["wq"].shape
    F = stacked["w1"].shape[2]
    assert H == num_heads and hd * num_heads == D

    # Fused path keeps all weights + one batch's activations resident in VMEM.
    weight_bytes = sum(int(v.size) * v.dtype.itemsize for v in stacked.values())
    act_bytes = 4 * (S * (3 * D + F) + num_heads * S * S + 4 * S * D)
    # TODO(synk): for large D / S switch to a streamed/tiled multi-kernel path.
    assert weight_bytes + act_bytes < 8 * 1024 * 1024, "fused path needs VMEM-resident weights"

    kernel = functools.partial(_encoder_kernel, num_layers=L, num_heads=num_heads,
                               head_dim=hd, eps=eps)

    def full(shape):
        n = len(shape)
        return pl.BlockSpec(shape, lambda b: (0,) * n)    # whole array, VMEM resident

    in_specs = [pl.BlockSpec((1, S, D), lambda b: (b, 0, 0))]
    in_specs += [full(tuple(stacked[n].shape)) for n in _WEIGHT_ORDER]

    flops_layer = (2 * S * D * (3 * D)            # qkv projection
                   + num_heads * 4 * S * S * hd   # scores + PV
                   + 2 * S * D * D                # out projection
                   + 4 * S * D * F)               # FF1 + FF2
    cost = pl.CostEstimate(
        flops=B * L * flops_layer,
        transcendentals=B * L * num_heads * S * S,
        bytes_accessed=weight_bytes + 2 * int(x.size) * x.dtype.itemsize)

    return pl.pallas_call(
        kernel,
        out_shape=jax.ShapeDtypeStruct((B, S, D), x.dtype),
        grid=(B,),
        in_specs=in_specs,
        out_specs=pl.BlockSpec((1, S, D), lambda b: (b, 0, 0)),
        compiler_params=pltpu.CompilerParams(dimension_semantics=("parallel",)),
        cost_estimate=cost,
    )(x, *(stacked[n] for n in _WEIGHT_ORDER))


# ------------------------------ parameter construction ------------------------------ #

def init_layer_params(key, model_dim, num_heads):
    d = model_dim
    dff = 4 * model_dim
    ks = jax.random.split(key, 4)
    s_in = 1.0 / (d ** 0.5)
    s_ff = 1.0 / (dff ** 0.5)
    return {
        "w_qkv": jax.random.normal(ks[0], (d, 3 * d), jnp.float32) * s_in,   # [Q|K|V] cols
        "b_qkv": jnp.zeros((3 * d,), jnp.float32),
        "w_out": jax.random.normal(ks[1], (d, d), jnp.float32) * s_in,
        "b_out": jnp.zeros((d,), jnp.float32),
        "ln1_g": jnp.ones((d,), jnp.float32),
        "ln1_b": jnp.zeros((d,), jnp.float32),
        "w_ff1": jax.random.normal(ks[2], (d, dff), jnp.float32) * s_in,
        "b_ff1": jnp.zeros((dff,), jnp.float32),
        "w_ff2": jax.random.normal(ks[3], (dff, d), jnp.float32) * s_ff,
        "b_ff2": jnp.zeros((d,), jnp.float32),
        "ln2_g": jnp.ones((d,), jnp.float32),
        "ln2_b": jnp.zeros((d,), jnp.float32),
    }


def stack_and_split_heads(layer_params, num_heads):
    """Wrapper-side layout plumbing: stack layers and split QKV/out-proj weights per head,
    so the kernel never lane-slices activations or concatenates head outputs."""
    L = len(layer_params)
    D = layer_params[0]["w_qkv"].shape[0]
    F = layer_params[0]["w_ff1"].shape[1]
    hd = D // num_heads

    def stk(name):
        return jnp.stack([p[name] for p in layer_params])

    w_qkv = stk("w_qkv")                                                   # [L, D, 3D]
    w_qkv = w_qkv.reshape(L, D, 3, num_heads, hd).transpose(0, 2, 3, 1, 4)  # [L,3,H,D,hd]
    b_qkv = stk("b_qkv").reshape(L, 3, num_heads, 1, hd)                   # [L,3,H,1,hd]
    w_out = stk("w_out").reshape(L, num_heads, hd, D)                      # rows per head

    return {
        "wq": w_qkv[:, 0], "wk": w_qkv[:, 1], "wv": w_qkv[:, 2],
        "bq": b_qkv[:, 0], "bk": b_qkv[:, 1], "bv": b_qkv[:, 2],
        "wo": w_out, "bo": stk("b_out").reshape(L, 1, D),
        "g1": stk("ln1_g").reshape(L, 1, D), "be1": stk("ln1_b").reshape(L, 1, D),
        "w1": stk("w_ff1"), "b1": stk("b_ff1").reshape(L, 1, F),
        "w2": stk("w_ff2"), "b2": stk("b_ff2").reshape(L, 1, D),
        "g2": stk("ln2_g").reshape(L, 1, D), "be2": stk("ln2_b").reshape(L, 1, D),
    }


# ------------------------------- pure-JAX reference -------------------------------- #

def _ln_ref(y, g, b, eps):
    mu = y.mean(axis=-1, keepdims=True)
    var = ((y - mu) ** 2).mean(axis=-1, keepdims=True)
    return (y - mu) / jnp.sqrt(var + eps) * g + b


def encoder_reference(x, layer_params, num_heads, *, eps=1e-5):
    B, S, D = x.shape
    hd = D // num_heads
    for p in layer_params:
        qkv = x @ p["w_qkv"] + p["b_qkv"]
        q, k, v = jnp.split(qkv, 3, axis=-1)
        split = lambda t: t.reshape(B, S, num_heads, hd).transpose(0, 2, 1, 3)
        q, k, v = split(q), split(k), split(v)
        s = jnp.einsum("bhqd,bhkd->bhqk", q, k) / (hd ** 0.5)
        a = jax.nn.softmax(s, axis=-1)
        o = jnp.einsum("bhqk,bhkd->bhqd", a, v)
        o = o.transpose(0, 2, 1, 3).reshape(B, S, D)
        x = _ln_ref(x + o @ p["w_out"] + p["b_out"], p["ln1_g"], p["ln1_b"], eps)
        h = jax.nn.relu(x @ p["w_ff1"] + p["b_ff1"])
        x = _ln_ref(x + h @ p["w_ff2"] + p["b_ff2"], p["ln2_g"], p["ln2_b"], eps)
    return x


# ----------------------------------------- main ------------------------------------ #

if __name__ == "__main__":
    model_dim = 32
    num_layers = 2
    num_heads = 4
    dropout = 0.1          # identity at inference
    batch, seq = 2, 8

    root = jax.random.PRNGKey(0)
    x_key, *layer_keys = jax.random.split(root, num_layers + 1)

    x = jax.random.normal(x_key, (batch, seq, model_dim), jnp.float32)
    layer_params = [init_layer_params(k, model_dim, num_heads) for k in layer_keys]
    stacked = stack_and_split_heads(layer_params, num_heads)

    fwd = jax.jit(functools.partial(fused_transformer_encoder, num_heads=num_heads))
    out = fwd(x, stacked)
    jax.block_until_ready(out)

    ref = encoder_reference(x, layer_params, num_heads)
    err = float(jnp.max(jnp.abs(out - ref)))

    assert out.shape == (batch, seq, model_dim)
    assert bool(jnp.all(jnp.isfinite(out)))
    assert err < 1e-2, f"max abs error vs reference: {err}"
    print("KERNEL_OK")
</pallas_src>

<mosaic_0001>
module attributes {stable_mosaic.version = 11 : i64} {
  func.func @_encoder_kernel(%arg0: i32, %arg1: memref<1x8x32xf32, #tpu.memory_space<vmem>>, %arg2: memref<2x4x32x8xf32, #tpu.memory_space<vmem>>, %arg3: memref<2x4x32x8xf32, #tpu.memory_space<vmem>>, %arg4: memref<2x4x32x8xf32, #tpu.memory_space<vmem>>, %arg5: memref<2x4x1x8xf32, #tpu.memory_space<vmem>>, %arg6: memref<2x4x1x8xf32, #tpu.memory_space<vmem>>, %arg7: memref<2x4x1x8xf32, #tpu.memory_space<vmem>>, %arg8: memref<2x4x8x32xf32, #tpu.memory_space<vmem>>, %arg9: memref<2x1x32xf32, #tpu.memory_space<vmem>>, %arg10: memref<2x1x32xf32, #tpu.memory_space<vmem>>, %arg11: memref<2x1x32xf32, #tpu.memory_space<vmem>>, %arg12: memref<2x32x128xf32, #tpu.memory_space<vmem>>, %arg13: memref<2x1x128xf32, #tpu.memory_space<vmem>>, %arg14: memref<2x128x32xf32, #tpu.memory_space<vmem>>, %arg15: memref<2x1x32xf32, #tpu.memory_space<vmem>>, %arg16: memref<2x1x32xf32, #tpu.memory_space<vmem>>, %arg17: memref<2x1x32xf32, #tpu.memory_space<vmem>>, %arg18: memref<1x8x32xf32, #tpu.memory_space<vmem>>) attributes {dimension_semantics = [#tpu.dimension_semantics<parallel>], iteration_bounds = array<i64: 2>, scalar_prefetch = 0 : i64, scratch_operands = 0 : i64, tpu.core_type = #tpu.core_type<tc>, window_params = [{transform_indices = @transform_0, window_bounds = array<i64: 1, 8, 32>}, {pipeline_mode = #tpu.pipeline_mode<synchronous>, transform_indices = @transform_1, window_bounds = array<i64: 2, 4, 32, 8>}, {pipeline_mode = #tpu.pipeline_mode<synchronous>, transform_indices = @transform_2, window_bounds = array<i64: 2, 4, 32, 8>}, {pipeline_mode = #tpu.pipeline_mode<synchronous>, transform_indices = @transform_3, window_bounds = array<i64: 2, 4, 32, 8>}, {pipeline_mode = #tpu.pipeline_mode<synchronous>, transform_indices = @transform_4, window_bounds = array<i64: 2, 4, 1, 8>}, {pipeline_mode = #tpu.pipeline_mode<synchronous>, transform_indices = @transform_5, window_bounds = array<i64: 2, 4, 1, 8>}, {pipeline_mode = #tpu.pipeline_mode<synchronous>, transform_indices = @transform_6, window_bounds = array<i64: 2, 4, 1, 8>}, {pipeline_mode = #tpu.pipeline_mode<synchronous>, transform_indices = @transform_7, window_bounds = array<i64: 2, 4, 8, 32>}, {pipeline_mode = #tpu.pipeline_mode<synchronous>, transform_indices = @transform_8, window_bounds = array<i64: 2, 1, 32>}, {pipeline_mode = #tpu.pipeline_mode<synchronous>, transform_indices = @transform_9, window_bounds = array<i64: 2, 1, 32>}, {pipeline_mode = #tpu.pipeline_mode<synchronous>, transform_indices = @transform_10, window_bounds = array<i64: 2, 1, 32>}, {pipeline_mode = #tpu.pipeline_mode<synchronous>, transform_indices = @transform_11, window_bounds = array<i64: 2, 32, 128>}, {pipeline_mode = #tpu.pipeline_mode<synchronous>, transform_indices = @transform_12, window_bounds = array<i64: 2, 1, 128>}, {pipeline_mode = #tpu.pipeline_mode<synchronous>, transform_indices = @transform_13, window_bounds = array<i64: 2, 128, 32>}, {pipeline_mode = #tpu.pipeline_mode<synchronous>, transform_indices = @transform_14, window_bounds = array<i64: 2, 1, 32>}, {pipeline_mode = #tpu.pipeline_mode<synchronous>, transform_indices = @transform_15, window_bounds = array<i64: 2, 1, 32>}, {pipeline_mode = #tpu.pipeline_mode<synchronous>, transform_indices = @transform_16, window_bounds = array<i64: 2, 1, 32>}, {transform_indices = @transform_17, window_bounds = array<i64: 1, 8, 32>}]} {
    %c0 = arith.constant 0 : index
    %c0_0 = arith.constant 0 : index
    %c0_1 = arith.constant 0 : index
    %0 = vector.load %arg1[%c0, %c0_0, %c0_1] : memref<1x8x32xf32, #tpu.memory_space<vmem>>, vector<1x8x32xf32>
    %1 = vector.shape_cast %0 : vector<1x8x32xf32> to vector<8x32xf32>
    %cst = arith.constant 0.000000e+00 : f32
    %2 = vector.broadcast %cst : f32 to vector<8x32xf32>
    %c0_2 = arith.constant 0 : index
    %c0_3 = arith.constant 0 : index
    %c0_4 = arith.constant 0 : index
    %c0_5 = arith.constant 0 : index
    %3 = vector.load %arg2[%c0_2, %c0_3, %c0_4, %c0_5] : memref<2x4x32x8xf32, #tpu.memory_space<vmem>>, vector<1x1x32x8xf32>
    %4 = vector.shape_cast %3 : vector<1x1x32x8xf32> to vector<32x8xf32>
    %cst_6 = arith.constant dense<0.000000e+00> : vector<8x8xf32>
    %5 = tpu.matmul %1, %4, %cst_6 {dimension_numbers = #tpu.dot_dimension_numbers<[1], [0], [0], [1], [0, 0, 1, 1], [], []>} : vector<8x32xf32>, vector<32x8xf32>, vector<8x8xf32> -> vector<8x8xf32>
    %c0_7 = arith.constant 0 : index
    %c0_8 = arith.constant 0 : index
    %c0_9 = arith.constant 0 : index
    %c0_10 = arith.constant 0 : index
    %6 = vector.load %arg5[%c0_7, %c0_8, %c0_9, %c0_10] : memref<2x4x1x8xf32, #tpu.memory_space<vmem>>, vector<1x1x1x8xf32>
    %7 = vector.shape_cast %6 : vector<1x1x1x8xf32> to vector<1x8xf32>
    %8 = vector.broadcast %7 : vector<1x8xf32> to vector<8x8xf32>
    %9 = arith.addf %5, %8 : vector<8x8xf32>
    %c0_11 = arith.constant 0 : index
    %c0_12 = arith.constant 0 : index
    %c0_13 = arith.constant 0 : index
    %c0_14 = arith.constant 0 : index
    %10 = vector.load %arg3[%c0_11, %c0_12, %c0_13, %c0_14] : memref<2x4x32x8xf32, #tpu.memory_space<vmem>>, vector<1x1x32x8xf32>
    %11 = vector.shape_cast %10 : vector<1x1x32x8xf32> to vector<32x8xf32>
    %cst_15 = arith.constant dense<0.000000e+00> : vector<8x8xf32>
    %12 = tpu.matmul %1, %11, %cst_15 {dimension_numbers = #tpu.dot_dimension_numbers<[1], [0], [0], [1], [0, 0, 1, 1], [], []>} : vector<8x32xf32>, vector<32x8xf32>, vector<8x8xf32> -> vector<8x8xf32>
    %c0_16 = arith.constant 0 : index
    %c0_17 = arith.constant 0 : index
    %c0_18 = arith.constant 0 : index
    %c0_19 = arith.constant 0 : index
    %13 = vector.load %arg6[%c0_16, %c0_17, %c0_18, %c0_19] : memref<2x4x1x8xf32, #tpu.memory_space<vmem>>, vector<1x1x1x8xf32>
    %14 = vector.shape_cast %13 : vector<1x1x1x8xf32> to vector<1x8xf32>
    %15 = vector.broadcast %14 : vector<1x8xf32> to vector<8x8xf32>
    %16 = arith.addf %12, %15 : vector<8x8xf32>
    %c0_20 = arith.constant 0 : index
    %c0_21 = arith.constant 0 : index
    %c0_22 = arith.constant 0 : index
    %c0_23 = arith.constant 0 : index
    %17 = vector.load %arg4[%c0_20, %c0_21, %c0_22, %c0_23] : memref<2x4x32x8xf32, #tpu.memory_space<vmem>>, vector<1x1x32x8xf32>
    %18 = vector.shape_cast %17 : vector<1x1x32x8xf32> to vector<32x8xf32>
    %cst_24 = arith.constant dense<0.000000e+00> : vector<8x8xf32>
    %19 = tpu.matmul %1, %18, %cst_24 {dimension_numbers = #tpu.dot_dimension_numbers<[1], [0], [0], [1], [0, 0, 1, 1], [], []>} : vector<8x32xf32>, vector<32x8xf32>, vector<8x8xf32> -> vector<8x8xf32>
    %c0_25 = arith.constant 0 : index
    %c0_26 = arith.constant 0 : index
    %c0_27 = arith.constant 0 : index
    %c0_28 = arith.constant 0 : index
    %20 = vector.load %arg7[%c0_25, %c0_26, %c0_27, %c0_28] : memref<2x4x1x8xf32, #tpu.memory_space<vmem>>, vector<1x1x1x8xf32>
    %21 = vector.shape_cast %20 : vector<1x1x1x8xf32> to vector<1x8xf32>
    %22 = vector.broadcast %21 : vector<1x8xf32> to vector<8x8xf32>
    %23 = arith.addf %19, %22 : vector<8x8xf32>
    %cst_29 = arith.constant dense<0.000000e+00> : vector<8x8xf32>
    %24 = tpu.matmul %9, %16, %cst_29 {dimension_numbers = #tpu.dot_dimension_numbers<[1], [1], [0], [0], [0, 0, 1, 0], [], []>} : vector<8x8xf32>, vector<8x8xf32>, vector<8x8xf32> -> vector<8x8xf32>
    %cst_30 = arith.constant 0.353553385 : f32
    %25 = vector.broadcast %cst_30 : f32 to vector<8x8xf32>
    %26 = arith.mulf %24, %25 : vector<8x8xf32>
    %cst_31 = arith.constant dense<0xFF800000> : vector<8xf32>
    %27 = vector.multi_reduction <maximumf>, %26, %cst_31 [1] : vector<8x8xf32> to vector<8xf32>
    %28 = vector.shape_cast %27 : vector<8xf32> to vector<8x1xf32>
    %29 = vector.broadcast %28 : vector<8x1xf32> to vector<8x8xf32>
    %30 = arith.subf %26, %29 : vector<8x8xf32>
    %31 = math.exp %30 : vector<8x8xf32>
    %cst_32 = arith.constant dense<0.000000e+00> : vector<8xf32>
    %32 = vector.multi_reduction <add>, %31, %cst_32 [1] : vector<8x8xf32> to vector<8xf32>
    %33 = vector.shape_cast %32 : vector<8xf32> to vector<8x1xf32>
    %34 = vector.broadcast %33 : vector<8x1xf32> to vector<8x8xf32>
    %35 = arith.divf %31, %34 : vector<8x8xf32>
    %cst_33 = arith.constant dense<0.000000e+00> : vector<8x8xf32>
    %36 = tpu.matmul %35, %23, %cst_33 {dimension_numbers = #tpu.dot_dimension_numbers<[1], [0], [0], [1], [0, 0, 1, 1], [], []>} : vector<8x8xf32>, vector<8x8xf32>, vector<8x8xf32> -> vector<8x8xf32>
    %c0_34 = arith.constant 0 : index
    %c0_35 = arith.constant 0 : index
    %c0_36 = arith.constant 0 : index
    %c0_37 = arith.constant 0 : index
    %37 = vector.load %arg8[%c0_34, %c0_35, %c0_36, %c0_37] : memref<2x4x8x32xf32, #tpu.memory_space<vmem>>, vector<1x1x8x32xf32>
    %38 = vector.shape_cast %37 : vector<1x1x8x32xf32> to vector<8x32xf32>
    %cst_38 = arith.constant dense<0.000000e+00> : vector<8x32xf32>
    %39 = tpu.matmul %36, %38, %cst_38 {dimension_numbers = #tpu.dot_dimension_numbers<[1], [0], [0], [1], [0, 0, 1, 1], [], []>} : vector<8x8xf32>, vector<8x32xf32>, vector<8x32xf32> -> vector<8x32xf32>
    %40 = arith.addf %2, %39 : vector<8x32xf32>
    %c0_39 = arith.constant 0 : index
    %c1 = arith.constant 1 : index
    %c0_40 = arith.constant 0 : index
    %c0_41 = arith.constant 0 : index
    %41 = vector.load %arg2[%c0_39, %c1, %c0_40, %c0_41] : memref<2x4x32x8xf32, #tpu.memory_space<vmem>>, vector<1x1x32x8xf32>
    %42 = vector.shape_cast %41 : vector<1x1x32x8xf32> to vector<32x8xf32>
    %cst_42 = arith.constant dense<0.000000e+00> : vector<8x8xf32>
    %43 = tpu.matmul %1, %42, %cst_42 {dimension_numbers = #tpu.dot_dimension_numbers<[1], [0], [0], [1], [0, 0, 1, 1], [], []>} : vector<8x32xf32>, vector<32x8xf32>, vector<8x8xf32> -> vector<8x8xf32>
    %c0_43 = arith.constant 0 : index
    %c1_44 = arith.constant 1 : index
    %c0_45 = arith.constant 0 : index
    %c0_46 = arith.constant 0 : index
    %44 = vector.load %arg5[%c0_43, %c1_44, %c0_45, %c0_46] : memref<2x4x1x8xf32, #tpu.memory_space<vmem>>, vector<1x1x1x8xf32>
    %45 = vector.shape_cast %44 : vector<1x1x1x8xf32> to vector<1x8xf32>
    %46 = vector.broadcast %45 : vector<1x8xf32> to vector<8x8xf32>
    %47 = arith.addf %43, %46 : vector<8x8xf32>
    %c0_47 = arith.constant 0 : index
    %c1_48 = arith.constant 1 : index
    %c0_49 = arith.constant 0 : index
    %c0_50 = arith.constant 0 : index
    %48 = vector.load %arg3[%c0_47, %c1_48, %c0_49, %c0_50] : memref<2x4x32x8xf32, #tpu.memory_space<vmem>>, vector<1x1x32x8xf32>
    %49 = vector.shape_cast %48 : vector<1x1x32x8xf32> to vector<32x8xf32>
    %cst_51 = arith.constant dense<0.000000e+00> : vector<8x8xf32>
    %50 = tpu.matmul %1, %49, %cst_51 {dimension_numbers = #tpu.dot_dimension_numbers<[1], [0], [0], [1], [0, 0, 1, 1], [], []>} : vector<8x32xf32>, vector<32x8xf32>, vector<8x8xf32> -> vector<8x8xf32>
    %c0_52 = arith.constant 0 : index
    %c1_53 = arith.constant 1 : index
    %c0_54 = arith.constant 0 : index
    %c0_55 = arith.constant 0 : index
    %51 = vector.load %arg6[%c0_52, %c1_53, %c0_54, %c0_55] : memref<2x4x1x8xf32, #tpu.memory_space<vmem>>, vector<1x1x1x8xf32>
    %52 = vector.shape_cast %51 : vector<1x1x1x8xf32> to vector<1x8xf32>
    %53 = vector.broadcast %52 : vector<1x8xf32> to vector<8x8xf32>
    %54 = arith.addf %50, %53 : vector<8x8xf32>
    %c0_56 = arith.constant 0 : index
    %c1_57 = arith.constant 1 : index
    %c0_58 = arith.constant 0 : index
    %c0_59 = arith.constant 0 : index
    %55 = vector.load %arg4[%c0_56, %c1_57, %c0_58, %c0_59] : memref<2x4x32x8xf32, #tpu.memory_space<vmem>>, vector<1x1x32x8xf32>
    %56 = vector.shape_cast %55 : vector<1x1x32x8xf32> to vector<32x8xf32>
    %cst_60 = arith.constant dense<0.000000e+00> : vector<8x8xf32>
    %57 = tpu.matmul %1, %56, %cst_60 {dimension_numbers = #tpu.dot_dimension_numbers<[1], [0], [0], [1], [0, 0, 1, 1], [], []>} : vector<8x32xf32>, vector<32x8xf32>, vector<8x8xf32> -> vector<8x8xf32>
    %c0_61 = arith.constant 0 : index
    %c1_62 = arith.constant 1 : index
    %c0_63 = arith.constant 0 : index
    %c0_64 = arith.constant 0 : index
    %58 = vector.load %arg7[%c0_61, %c1_62, %c0_63, %c0_64] : memref<2x4x1x8xf32, #tpu.memory_space<vmem>>, vector<1x1x1x8xf32>
    %59 = vector.shape_cast %58 : vector<1x1x1x8xf32> to vector<1x8xf32>
    %60 = vector.broadcast %59 : vector<1x8xf32> to vector<8x8xf32>
    %61 = arith.addf %57, %60 : vector<8x8xf32>
    %cst_65 = arith.constant dense<0.000000e+00> : vector<8x8xf32>
    %62 = tpu.matmul %47, %54, %cst_65 {dimension_numbers = #tpu.dot_dimension_numbers<[1], [1], [0], [0], [0, 0, 1, 0], [], []>} : vector<8x8xf32>, vector<8x8xf32>, vector<8x8xf32> -> vector<8x8xf32>
    %cst_66 = arith.constant 0.353553385 : f32
    %63 = vector.broadcast %cst_66 : f32 to vector<8x8xf32>
    %64 = arith.mulf %62, %63 : vector<8x8xf32>
    %cst_67 = arith.constant dense<0xFF800000> : vector<8xf32>
    %65 = vector.multi_reduction <maximumf>, %64, %cst_67 [1] : vector<8x8xf32> to vector<8xf32>
    %66 = vector.shape_cast %65 : vector<8xf32> to vector<8x1xf32>
    %67 = vector.broadcast %66 : vector<8x1xf32> to vector<8x8xf32>
    %68 = arith.subf %64, %67 : vector<8x8xf32>
    %69 = math.exp %68 : vector<8x8xf32>
    %cst_68 = arith.constant dense<0.000000e+00> : vector<8xf32>
    %70 = vector.multi_reduction <add>, %69, %cst_68 [1] : vector<8x8xf32> to vector<8xf32>
    %71 = vector.shape_cast %70 : vector<8xf32> to vector<8x1xf32>
    %72 = vector.broadcast %71 : vector<8x1xf32> to vector<8x8xf32>
    %73 = arith.divf %69, %72 : vector<8x8xf32>
    %cst_69 = arith.constant dense<0.000000e+00> : vector<8x8xf32>
    %74 = tpu.matmul %73, %61, %cst_69 {dimension_numbers = #tpu.dot_dimension_numbers<[1], [0], [0], [1], [0, 0, 1, 1], [], []>} : vector<8x8xf32>, vector<8x8xf32>, vector<8x8xf32> -> vector<8x8xf32>
    %c0_70 = arith.constant 0 : index
    %c1_71 = arith.constant 1 : index
    %c0_72 = arith.constant 0 : index
    %c0_73 = arith.constant 0 : index
    %75 = vector.load %arg8[%c0_70, %c1_71, %c0_72, %c0_73] : memref<2x4x8x32xf32, #tpu.memory_space<vmem>>, vector<1x1x8x32xf32>
    %76 = vector.shape_cast %75 : vector<1x1x8x32xf32> to vector<8x32xf32>
    %cst_74 = arith.constant dense<0.000000e+00> : vector<8x32xf32>
    %77 = tpu.matmul %74, %76, %cst_74 {dimension_numbers = #tpu.dot_dimension_numbers<[1], [0], [0], [1], [0, 0, 1, 1], [], []>} : vector<8x8xf32>, vector<8x32xf32>, vector<8x32xf32> -> vector<8x32xf32>
    %78 = arith.addf %40, %77 : vector<8x32xf32>
    %c0_75 = arith.constant 0 : index
    %c2 = arith.constant 2 : index
    %c0_76 = arith.constant 0 : index
    %c0_77 = arith.constant 0 : index
    %79 = vector.load %arg2[%c0_75, %c2, %c0_76, %c0_77] : memref<2x4x32x8xf32, #tpu.memory_space<vmem>>, vector<1x1x32x8xf32>
    %80 = vector.shape_cast %79 : vector<1x1x32x8xf32> to vector<32x8xf32>
    %cst_78 = arith.constant dense<0.000000e+00> : vector<8x8xf32>
    %81 = tpu.matmul %1, %80, %cst_78 {dimension_numbers = #tpu.dot_dimension_numbers<[1], [0], [0], [1], [0, 0, 1, 1], [], []>} : vector<8x32xf32>, vector<32x8xf32>, vector<8x8xf32> -> vector<8x8xf32>
    %c0_79 = arith.constant 0 : index
    %c2_80 = arith.constant 2 : index
    %c0_81 = arith.constant 0 : index
    %c0_82 = arith.constant 0 : index
    %82 = vector.load %arg5[%c0_79, %c2_80, %c0_81, %c0_82] : memref<2x4x1x8xf32, #tpu.memory_space<vmem>>, vector<1x1x1x8xf32>
    %83 = vector.shape_cast %82 : vector<1x1x1x8xf32> to vector<1x8xf32>
    %84 = vector.broadcast %83 : vector<1x8xf32> to vector<8x8xf32>
    %85 = arith.addf %81, %84 : vector<8x8xf32>
    %c0_83 = arith.constant 0 : index
    %c2_84 = arith.constant 2 : index
    %c0_85 = arith.constant 0 : index
    %c0_86 = arith.constant 0 : index
    %86 = vector.load %arg3[%c0_83, %c2_84, %c0_85, %c0_86] : memref<2x4x32x8xf32, #tpu.memory_space<vmem>>, vector<1x1x32x8xf32>
    %87 = vector.shape_cast %86 : vector<1x1x32x8xf32> to vector<32x8xf32>
    %cst_87 = arith.constant dense<0.000000e+00> : vector<8x8xf32>
    %88 = tpu.matmul %1, %87, %cst_87 {dimension_numbers = #tpu.dot_dimension_numbers<[1], [0], [0], [1], [0, 0, 1, 1], [], []>} : vector<8x32xf32>, vector<32x8xf32>, vector<8x8xf32> -> vector<8x8xf32>
    %c0_88 = arith.constant 0 : index
    %c2_89 = arith.constant 2 : index
    %c0_90 = arith.constant 0 : index
    %c0_91 = arith.constant 0 : index
    %89 = vector.load %arg6[%c0_88, %c2_89, %c0_90, %c0_91] : memref<2x4x1x8xf32, #tpu.memory_space<vmem>>, vector<1x1x1x8xf32>
    %90 = vector.shape_cast %89 : vector<1x1x1x8xf32> to vector<1x8xf32>
    %91 = vector.broadcast %90 : vector<1x8xf32> to vector<8x8xf32>
    %92 = arith.addf %88, %91 : vector<8x8xf32>
    %c0_92 = arith.constant 0 : index
    %c2_93 = arith.constant 2 : index
    %c0_94 = arith.constant 0 : index
    %c0_95 = arith.constant 0 : index
    %93 = vector.load %arg4[%c0_92, %c2_93, %c0_94, %c0_95] : memref<2x4x32x8xf32, #tpu.memory_space<vmem>>, vector<1x1x32x8xf32>
    %94 = vector.shape_cast %93 : vector<1x1x32x8xf32> to vector<32x8xf32>
    %cst_96 = arith.constant dense<0.000000e+00> : vector<8x8xf32>
    %95 = tpu.matmul %1, %94, %cst_96 {dimension_numbers = #tpu.dot_dimension_numbers<[1], [0], [0], [1], [0, 0, 1, 1], [], []>} : vector<8x32xf32>, vector<32x8xf32>, vector<8x8xf32> -> vector<8x8xf32>
    %c0_97 = arith.constant 0 : index
    %c2_98 = arith.constant 2 : index
    %c0_99 = arith.constant 0 : index
    %c0_100 = arith.constant 0 : index
    %96 = vector.load %arg7[%c0_97, %c2_98, %c0_99, %c0_100] : memref<2x4x1x8xf32, #tpu.memory_space<vmem>>, vector<1x1x1x8xf32>
    %97 = vector.shape_cast %96 : vector<1x1x1x8xf32> to vector<1x8xf32>
    %98 = vector.broadcast %97 : vector<1x8xf32> to vector<8x8xf32>
    %99 = arith.addf %95, %98 : vector<8x8xf32>
    %cst_101 = arith.constant dense<0.000000e+00> : vector<8x8xf32>
    %100 = tpu.matmul %85, %92, %cst_101 {dimension_numbers = #tpu.dot_dimension_numbers<[1], [1], [0], [0], [0, 0, 1, 0], [], []>} : vector<8x8xf32>, vector<8x8xf32>, vector<8x8xf32> -> vector<8x8xf32>
    %cst_102 = arith.constant 0.353553385 : f32
    %101 = vector.broadcast %cst_102 : f32 to vector<8x8xf32>
    %102 = arith.mulf %100, %101 : vector<8x8xf32>
    %cst_103 = arith.constant dense<0xFF800000> : vector<8xf32>
    %103 = vector.multi_reduction <maximumf>, %102, %cst_103 [1] : vector<8x8xf32> to vector<8xf32>
    %104 = vector.shape_cast %103 : vector<8xf32> to vector<8x1xf32>
    %105 = vector.broadcast %104 : vector<8x1xf32> to vector<8x8xf32>
    %106 = arith.subf %102, %105 : vector<8x8xf32>
    %107 = math.exp %106 : vector<8x8xf32>
    %cst_104 = arith.constant dense<0.000000e+00> : vector<8xf32>
    %108 = vector.multi_reduction <add>, %107, %cst_104 [1] : vector<8x8xf32> to vector<8xf32>
    %109 = vector.shape_cast %108 : vector<8xf32> to vector<8x1xf32>
    %110 = vector.broadcast %109 : vector<8x1xf32> to vector<8x8xf32>
    %111 = arith.divf %107, %110 : vector<8x8xf32>
    %cst_105 = arith.constant dense<0.000000e+00> : vector<8x8xf32>
    %112 = tpu.matmul %111, %99, %cst_105 {dimension_numbers = #tpu.dot_dimension_numbers<[1], [0], [0], [1], [0, 0, 1, 1], [], []>} : vector<8x8xf32>, vector<8x8xf32>, vector<8x8xf32> -> vector<8x8xf32>
    %c0_106 = arith.constant 0 : index
    %c2_107 = arith.constant 2 : index
    %c0_108 = arith.constant 0 : index
    %c0_109 = arith.constant 0 : index
    %113 = vector.load %arg8[%c0_106, %c2_107, %c0_108, %c0_109] : memref<2x4x8x32xf32, #tpu.memory_space<vmem>>, vector<1x1x8x32xf32>
    %114 = vector.shape_cast %113 : vector<1x1x8x32xf32> to vector<8x32xf32>
    %cst_110 = arith.constant dense<0.000000e+00> : vector<8x32xf32>
    %115 = tpu.matmul %112, %114, %cst_110 {dimension_numbers = #tpu.dot_dimension_numbers<[1], [0], [0], [1], [0, 0, 1, 1], [], []>} : vector<8x8xf32>, vector<8x32xf32>, vector<8x32xf32> -> vector<8x32xf32>
    %116 = arith.addf %78, %115 : vector<8x32xf32>
    %c0_111 = arith.constant 0 : index
    %c3 = arith.constant 3 : index
    %c0_112 = arith.constant 0 : index
    %c0_113 = arith.constant 0 : index
    %117 = vector.load %arg2[%c0_111, %c3, %c0_112, %c0_113] : memref<2x4x32x8xf32, #tpu.memory_space<vmem>>, vector<1x1x32x8xf32>
    %118 = vector.shape_cast %117 : vector<1x1x32x8xf32> to vector<32x8xf32>
    %cst_114 = arith.constant dense<0.000000e+00> : vector<8x8xf32>
    %119 = tpu.matmul %1, %118, %cst_114 {dimension_numbers = #tpu.dot_dimension_numbers<[1], [0], [0], [1], [0, 0, 1, 1], [], []>} : vector<8x32xf32>, vector<32x8xf32>, vector<8x8xf32> -> vector<8x8xf32>
    %c0_115 = arith.constant 0 : index
    %c3_116 = arith.constant 3 : index
    %c0_117 = arith.constant 0 : index
    %c0_118 = arith.constant 0 : index
    %120 = vector.load %arg5[%c0_115, %c3_116, %c0_117, %c0_118] : memref<2x4x1x8xf32, #tpu.memory_space<vmem>>, vector<1x1x1x8xf32>
    %121 = vector.shape_cast %120 : vector<1x1x1x8xf32> to vector<1x8xf32>
    %122 = vector.broadcast %121 : vector<1x8xf32> to vector<8x8xf32>
    %123 = arith.addf %119, %122 : vector<8x8xf32>
    %c0_119 = arith.constant 0 : index
    %c3_120 = arith.constant 3 : index
    %c0_121 = arith.constant 0 : index
    %c0_122 = arith.constant 0 : index
    %124 = vector.load %arg3[%c0_119, %c3_120, %c0_121, %c0_122] : memref<2x4x32x8xf32, #tpu.memory_space<vmem>>, vector<1x1x32x8xf32>
    %125 = vector.shape_cast %124 : vector<1x1x32x8xf32> to vector<32x8xf32>
    %cst_123 = arith.constant dense<0.000000e+00> : vector<8x8xf32>
    %126 = tpu.matmul %1, %125, %cst_123 {dimension_numbers = #tpu.dot_dimension_numbers<[1], [0], [0], [1], [0, 0, 1, 1], [], []>} : vector<8x32xf32>, vector<32x8xf32>, vector<8x8xf32> -> vector<8x8xf32>
    %c0_124 = arith.constant 0 : index
    %c3_125 = arith.constant 3 : index
    %c0_126 = arith.constant 0 : index
    %c0_127 = arith.constant 0 : index
    %127 = vector.load %arg6[%c0_124, %c3_125, %c0_126, %c0_127] : memref<2x4x1x8xf32, #tpu.memory_space<vmem>>, vector<1x1x1x8xf32>
    %128 = vector.shape_cast %127 : vector<1x1x1x8xf32> to vector<1x8xf32>
    %129 = vector.broadcast %128 : vector<1x8xf32> to vector<8x8xf32>
    %130 = arith.addf %126, %129 : vector<8x8xf32>
    %c0_128 = arith.constant 0 : index
    %c3_129 = arith.constant 3 : index
    %c0_130 = arith.constant 0 : index
    %c0_131 = arith.constant 0 : index
    %131 = vector.load %arg4[%c0_128, %c3_129, %c0_130, %c0_131] : memref<2x4x32x8xf32, #tpu.memory_space<vmem>>, vector<1x1x32x8xf32>
    %132 = vector.shape_cast %131 : vector<1x1x32x8xf32> to vector<32x8xf32>
    %cst_132 = arith.constant dense<0.000000e+00> : vector<8x8xf32>
    %133 = tpu.matmul %1, %132, %cst_132 {dimension_numbers = #tpu.dot_dimension_numbers<[1], [0], [0], [1], [0, 0, 1, 1], [], []>} : vector<8x32xf32>, vector<32x8xf32>, vector<8x8xf32> -> vector<8x8xf32>
    %c0_133 = arith.constant 0 : index
    %c3_134 = arith.constant 3 : index
    %c0_135 = arith.constant 0 : index
    %c0_136 = arith.constant 0 : index
    %134 = vector.load %arg7[%c0_133, %c3_134, %c0_135, %c0_136] : memref<2x4x1x8xf32, #tpu.memory_space<vmem>>, vector<1x1x1x8xf32>
    %135 = vector.shape_cast %134 : vector<1x1x1x8xf32> to vector<1x8xf32>
    %136 = vector.broadcast %135 : vector<1x8xf32> to vector<8x8xf32>
    %137 = arith.addf %133, %136 : vector<8x8xf32>
    %cst_137 = arith.constant dense<0.000000e+00> : vector<8x8xf32>
    %138 = tpu.matmul %123, %130, %cst_137 {dimension_numbers = #tpu.dot_dimension_numbers<[1], [1], [0], [0], [0, 0, 1, 0], [], []>} : vector<8x8xf32>, vector<8x8xf32>, vector<8x8xf32> -> vector<8x8xf32>
    %cst_138 = arith.constant 0.353553385 : f32
    %139 = vector.broadcast %cst_138 : f32 to vector<8x8xf32>
    %140 = arith.mulf %138, %139 : vector<8x8xf32>
    %cst_139 = arith.constant dense<0xFF800000> : vector<8xf32>
    %141 = vector.multi_reduction <maximumf>, %140, %cst_139 [1] : vector<8x8xf32> to vector<8xf32>
    %142 = vector.shape_cast %141 : vector<8xf32> to vector<8x1xf32>
    %143 = vector.broadcast %142 : vector<8x1xf32> to vector<8x8xf32>
    %144 = arith.subf %140, %143 : vector<8x8xf32>
    %145 = math.exp %144 : vector<8x8xf32>
    %cst_140 = arith.constant dense<0.000000e+00> : vector<8xf32>
    %146 = vector.multi_reduction <add>, %145, %cst_140 [1] : vector<8x8xf32> to vector<8xf32>
    %147 = vector.shape_cast %146 : vector<8xf32> to vector<8x1xf32>
    %148 = vector.broadcast %147 : vector<8x1xf32> to vector<8x8xf32>
    %149 = arith.divf %145, %148 : vector<8x8xf32>
    %cst_141 = arith.constant dense<0.000000e+00> : vector<8x8xf32>
    %150 = tpu.matmul %149, %137, %cst_141 {dimension_numbers = #tpu.dot_dimension_numbers<[1], [0], [0], [1], [0, 0, 1, 1], [], []>} : vector<8x8xf32>, vector<8x8xf32>, vector<8x8xf32> -> vector<8x8xf32>
    %c0_142 = arith.constant 0 : index
    %c3_143 = arith.constant 3 : index
    %c0_144 = arith.constant 0 : index
    %c0_145 = arith.constant 0 : index
    %151 = vector.load %arg8[%c0_142, %c3_143, %c0_144, %c0_145] : memref<2x4x8x32xf32, #tpu.memory_space<vmem>>, vector<1x1x8x32xf32>
    %152 = vector.shape_cast %151 : vector<1x1x8x32xf32> to vector<8x32xf32>
    %cst_146 = arith.constant dense<0.000000e+00> : vector<8x32xf32>
    %153 = tpu.matmul %150, %152, %cst_146 {dimension_numbers = #tpu.dot_dimension_numbers<[1], [0], [0], [1], [0, 0, 1, 1], [], []>} : vector<8x8xf32>, vector<8x32xf32>, vector<8x32xf32> -> vector<8x32xf32>
    %154 = arith.addf %116, %153 : vector<8x32xf32>
    %155 = arith.addf %1, %154 : vector<8x32xf32>
    %c0_147 = arith.constant 0 : index
    %c0_148 = arith.constant 0 : index
    %c0_149 = arith.constant 0 : index
    %156 = vector.load %arg9[%c0_147, %c0_148, %c0_149] : memref<2x1x32xf32, #tpu.memory_space<vmem>>, vector<1x1x32xf32>
    %157 = vector.shape_cast %156 : vector<1x1x32xf32> to vector<1x32xf32>
    %158 = vector.broadcast %157 : vector<1x32xf32> to vector<8x32xf32>
    %159 = arith.addf %155, %158 : vector<8x32xf32>
    %c0_150 = arith.constant 0 : index
    %c0_151 = arith.constant 0 : index
    %c0_152 = arith.constant 0 : index
    %160 = vector.load %arg10[%c0_150, %c0_151, %c0_152] : memref<2x1x32xf32, #tpu.memory_space<vmem>>, vector<1x1x32xf32>
    %161 = vector.shape_cast %160 : vector<1x1x32xf32> to vector<1x32xf32>
    %c0_153 = arith.constant 0 : index
    %c0_154 = arith.constant 0 : index
    %c0_155 = arith.constant 0 : index
    %162 = vector.load %arg11[%c0_153, %c0_154, %c0_155] : memref<2x1x32xf32, #tpu.memory_space<vmem>>, vector<1x1x32xf32>
    %163 = vector.shape_cast %162 : vector<1x1x32xf32> to vector<1x32xf32>
    %cst_156 = arith.constant dense<0.000000e+00> : vector<8xf32>
    %164 = vector.multi_reduction <add>, %159, %cst_156 [1] : vector<8x32xf32> to vector<8xf32>
    %165 = vector.shape_cast %164 : vector<8xf32> to vector<8x1xf32>
    %cst_157 = arith.constant 3.200000e+01 : f32
    %166 = vector.broadcast %cst_157 : f32 to vector<8x1xf32>
    %167 = arith.divf %165, %166 : vector<8x1xf32>
    %168 = vector.broadcast %167 : vector<8x1xf32> to vector<8x32xf32>
    %169 = arith.subf %159, %168 : vector<8x32xf32>
    %170 = arith.mulf %169, %169 : vector<8x32xf32>
    %cst_158 = arith.constant dense<0.000000e+00> : vector<8xf32>
    %171 = vector.multi_reduction <add>, %170, %cst_158 [1] : vector<8x32xf32> to vector<8xf32>
    %172 = vector.shape_cast %171 : vector<8xf32> to vector<8x1xf32>
    %cst_159 = arith.constant 3.200000e+01 : f32
    %173 = vector.broadcast %cst_159 : f32 to vector<8x1xf32>
    %174 = arith.divf %172, %173 : vector<8x1xf32>
    %175 = vector.broadcast %167 : vector<8x1xf32> to vector<8x32xf32>
    %176 = arith.subf %159, %175 : vector<8x32xf32>
    %cst_160 = arith.constant 9.99999974E-6 : f32
    %177 = vector.broadcast %cst_160 : f32 to vector<8x1xf32>
    %178 = arith.addf %174, %177 : vector<8x1xf32>
    %179 = math.rsqrt %178 : vector<8x1xf32>
    %180 = vector.broadcast %179 : vector<8x1xf32> to vector<8x32xf32>
    %181 = arith.mulf %176, %180 : vector<8x32xf32>
    %182 = vector.broadcast %161 : vector<1x32xf32> to vector<8x32xf32>
    %183 = arith.mulf %181, %182 : vector<8x32xf32>
    %184 = vector.broadcast %163 : vector<1x32xf32> to vector<8x32xf32>
    %185 = arith.addf %183, %184 : vector<8x32xf32>
    %c0_161 = arith.constant 0 : index
    %c0_162 = arith.constant 0 : index
    %c0_163 = arith.constant 0 : index
    %186 = vector.load %arg12[%c0_161, %c0_162, %c0_163] : memref<2x32x128xf32, #tpu.memory_space<vmem>>, vector<1x32x128xf32>
    %187 = vector.shape_cast %186 : vector<1x32x128xf32> to vector<32x128xf32>
    %cst_164 = arith.constant dense<0.000000e+00> : vector<8x128xf32>
    %188 = tpu.matmul %185, %187, %cst_164 {dimension_numbers = #tpu.dot_dimension_numbers<[1], [0], [0], [1], [0, 0, 1, 1], [], []>} : vector<8x32xf32>, vector<32x128xf32>, vector<8x128xf32> -> vector<8x128xf32>
    %c0_165 = arith.constant 0 : index
    %c0_166 = arith.constant 0 : index
    %c0_167 = arith.constant 0 : index
    %189 = vector.load %arg13[%c0_165, %c0_166, %c0_167] : memref<2x1x128xf32, #tpu.memory_space<vmem>>, vector<1x1x128xf32>
    %190 = vector.shape_cast %189 : vector<1x1x128xf32> to vector<1x128xf32>
    %191 = vector.broadcast %190 : vector<1x128xf32> to vector<8x128xf32>
    %192 = arith.addf %188, %191 : vector<8x128xf32>
    %cst_168 = arith.constant 0.000000e+00 : f32
    %193 = vector.broadcast %cst_168 : f32 to vector<8x128xf32>
    %194 = arith.maximumf %192, %193 : vector<8x128xf32>
    %c0_169 = arith.constant 0 : index
    %c0_170 = arith.constant 0 : index
    %c0_171 = arith.constant 0 : index
    %195 = vector.load %arg14[%c0_169, %c0_170, %c0_171] : memref<2x128x32xf32, #tpu.memory_space<vmem>>, vector<1x128x32xf32>
    %196 = vector.shape_cast %195 : vector<1x128x32xf32> to vector<128x32xf32>
    %cst_172 = arith.constant dense<0.000000e+00> : vector<8x32xf32>
    %197 = tpu.matmul %194, %196, %cst_172 {dimension_numbers = #tpu.dot_dimension_numbers<[1], [0], [0], [1], [0, 0, 1, 1], [], []>} : vector<8x128xf32>, vector<128x32xf32>, vector<8x32xf32> -> vector<8x32xf32>
    %c0_173 = arith.constant 0 : index
    %c0_174 = arith.constant 0 : index
    %c0_175 = arith.constant 0 : index
    %198 = vector.load %arg15[%c0_173, %c0_174, %c0_175] : memref<2x1x32xf32, #tpu.memory_space<vmem>>, vector<1x1x32xf32>
    %199 = vector.shape_cast %198 : vector<1x1x32xf32> to vector<1x32xf32>
    %200 = vector.broadcast %199 : vector<1x32xf32> to vector<8x32xf32>
    %201 = arith.addf %197, %200 : vector<8x32xf32>
    %202 = arith.addf %185, %201 : vector<8x32xf32>
    %c0_176 = arith.constant 0 : index
    %c0_177 = arith.constant 0 : index
    %c0_178 = arith.constant 0 : index
    %203 = vector.load %arg16[%c0_176, %c0_177, %c0_178] : memref<2x1x32xf32, #tpu.memory_space<vmem>>, vector<1x1x32xf32>
    %204 = vector.shape_cast %203 : vector<1x1x32xf32> to vector<1x32xf32>
    %c0_179 = arith.constant 0 : index
    %c0_180 = arith.constant 0 : index
    %c0_181 = arith.constant 0 : index
    %205 = vector.load %arg17[%c0_179, %c0_180, %c0_181] : memref<2x1x32xf32, #tpu.memory_space<vmem>>, vector<1x1x32xf32>
    %206 = vector.shape_cast %205 : vector<1x1x32xf32> to vector<1x32xf32>
    %cst_182 = arith.constant dense<0.000000e+00> : vector<8xf32>
    %207 = vector.multi_reduction <add>, %202, %cst_182 [1] : vector<8x32xf32> to vector<8xf32>
    %208 = vector.shape_cast %207 : vector<8xf32> to vector<8x1xf32>
    %cst_183 = arith.constant 3.200000e+01 : f32
    %209 = vector.broadcast %cst_183 : f32 to vector<8x1xf32>
    %210 = arith.divf %208, %209 : vector<8x1xf32>
    %211 = vector.broadcast %210 : vector<8x1xf32> to vector<8x32xf32>
    %212 = arith.subf %202, %211 : vector<8x32xf32>
    %213 = arith.mulf %212, %212 : vector<8x32xf32>
    %cst_184 = arith.constant dense<0.000000e+00> : vector<8xf32>
    %214 = vector.multi_reduction <add>, %213, %cst_184 [1] : vector<8x32xf32> to vector<8xf32>
    %215 = vector.shape_cast %214 : vector<8xf32> to vector<8x1xf32>
    %cst_185 = arith.constant 3.200000e+01 : f32
    %216 = vector.broadcast %cst_185 : f32 to vector<8x1xf32>
    %217 = arith.divf %215, %216 : vector<8x1xf32>
    %218 = vector.broadcast %210 : vector<8x1xf32> to vector<8x32xf32>
    %219 = arith.subf %202, %218 : vector<8x32xf32>
    %cst_186 = arith.constant 9.99999974E-6 : f32
    %220 = vector.broadcast %cst_186 : f32 to vector<8x1xf32>
    %221 = arith.addf %217, %220 : vector<8x1xf32>
    %222 = math.rsqrt %221 : vector<8x1xf32>
    %223 = vector.broadcast %222 : vector<8x1xf32> to vector<8x32xf32>
    %224 = arith.mulf %219, %223 : vector<8x32xf32>
    %225 = vector.broadcast %204 : vector<1x32xf32> to vector<8x32xf32>
    %226 = arith.mulf %224, %225 : vector<8x32xf32>
    %227 = vector.broadcast %206 : vector<1x32xf32> to vector<8x32xf32>
    %228 = arith.addf %226, %227 : vector<8x32xf32>
    %cst_187 = arith.constant 0.000000e+00 : f32
    %229 = vector.broadcast %cst_187 : f32 to vector<8x32xf32>
    %c1_188 = arith.constant 1 : index
    %c0_189 = arith.constant 0 : index
    %c0_190 = arith.constant 0 : index
    %c0_191 = arith.constant 0 : index
    %230 = vector.load %arg2[%c1_188, %c0_189, %c0_190, %c0_191] : memref<2x4x32x8xf32, #tpu.memory_space<vmem>>, vector<1x1x32x8xf32>
    %231 = vector.shape_cast %230 : vector<1x1x32x8xf32> to vector<32x8xf32>
    %cst_192 = arith.constant dense<0.000000e+00> : vector<8x8xf32>
    %232 = tpu.matmul %228, %231, %cst_192 {dimension_numbers = #tpu.dot_dimension_numbers<[1], [0], [0], [1], [0, 0, 1, 1], [], []>} : vector<8x32xf32>, vector<32x8xf32>, vector<8x8xf32> -> vector<8x8xf32>
    %c1_193 = arith.constant 1 : index
    %c0_194 = arith.constant 0 : index
    %c0_195 = arith.constant 0 : index
    %c0_196 = arith.constant 0 : index
    %233 = vector.load %arg5[%c1_193, %c0_194, %c0_195, %c0_196] : memref<2x4x1x8xf32, #tpu.memory_space<vmem>>, vector<1x1x1x8xf32>
    %234 = vector.shape_cast %233 : vector<1x1x1x8xf32> to vector<1x8xf32>
    %235 = vector.broadcast %234 : vector<1x8xf32> to vector<8x8xf32>
    %236 = arith.addf %232, %235 : vector<8x8xf32>
    %c1_197 = arith.constant 1 : index
    %c0_198 = arith.constant 0 : index
    %c0_199 = arith.constant 0 : index
    %c0_200 = arith.constant 0 : index
    %237 = vector.load %arg3[%c1_197, %c0_198, %c0_199, %c0_200] : memref<2x4x32x8xf32, #tpu.memory_space<vmem>>, vector<1x1x32x8xf32>
    %238 = vector.shape_cast %237 : vector<1x1x32x8xf32> to vector<32x8xf32>
    %cst_201 = arith.constant dense<0.000000e+00> : vector<8x8xf32>
    %239 = tpu.matmul %228, %238, %cst_201 {dimension_numbers = #tpu.dot_dimension_numbers<[1], [0], [0], [1], [0, 0, 1, 1], [], []>} : vector<8x32xf32>, vector<32x8xf32>, vector<8x8xf32> -> vector<8x8xf32>
    %c1_202 = arith.constant 1 : index
    %c0_203 = arith.constant 0 : index
    %c0_204 = arith.constant 0 : index
    %c0_205 = arith.constant 0 : index
    %240 = vector.load %arg6[%c1_202, %c0_203, %c0_204, %c0_205] : memref<2x4x1x8xf32, #tpu.memory_space<vmem>>, vector<1x1x1x8xf32>
    %241 = vector.shape_cast %240 : vector<1x1x1x8xf32> to vector<1x8xf32>
    %242 = vector.broadcast %241 : vector<1x8xf32> to vector<8x8xf32>
    %243 = arith.addf %239, %242 : vector<8x8xf32>
    %c1_206 = arith.constant 1 : index
    %c0_207 = arith.constant 0 : index
    %c0_208 = arith.constant 0 : index
    %c0_209 = arith.constant 0 : index
    %244 = vector.load %arg4[%c1_206, %c0_207, %c0_208, %c0_209] : memref<2x4x32x8xf32, #tpu.memory_space<vmem>>, vector<1x1x32x8xf32>
    %245 = vector.shape_cast %244 : vector<1x1x32x8xf32> to vector<32x8xf32>
    %cst_210 = arith.constant dense<0.000000e+00> : vector<8x8xf32>
    %246 = tpu.matmul %228, %245, %cst_210 {dimension_numbers = #tpu.dot_dimension_numbers<[1], [0], [0], [1], [0, 0, 1, 1], [], []>} : vector<8x32xf32>, vector<32x8xf32>, vector<8x8xf32> -> vector<8x8xf32>
    %c1_211 = arith.constant 1 : index
    %c0_212 = arith.constant 0 : index
    %c0_213 = arith.constant 0 : index
    %c0_214 = arith.constant 0 : index
    %247 = vector.load %arg7[%c1_211, %c0_212, %c0_213, %c0_214] : memref<2x4x1x8xf32, #tpu.memory_space<vmem>>, vector<1x1x1x8xf32>
    %248 = vector.shape_cast %247 : vector<1x1x1x8xf32> to vector<1x8xf32>
    %249 = vector.broadcast %248 : vector<1x8xf32> to vector<8x8xf32>
    %250 = arith.addf %246, %249 : vector<8x8xf32>
    %cst_215 = arith.constant dense<0.000000e+00> : vector<8x8xf32>
    %251 = tpu.matmul %236, %243, %cst_215 {dimension_numbers = #tpu.dot_dimension_numbers<[1], [1], [0], [0], [0, 0, 1, 0], [], []>} : vector<8x8xf32>, vector<8x8xf32>, vector<8x8xf32> -> vector<8x8xf32>
    %cst_216 = arith.constant 0.353553385 : f32
    %252 = vector.broadcast %cst_216 : f32 to vector<8x8xf32>
    %253 = arith.mulf %251, %252 : vector<8x8xf32>
    %cst_217 = arith.constant dense<0xFF800000> : vector<8xf32>
    %254 = vector.multi_reduction <maximumf>, %253, %cst_217 [1] : vector<8x8xf32> to vector<8xf32>
    %255 = vector.shape_cast %254 : vector<8xf32> to vector<8x1xf32>
    %256 = vector.broadcast %255 : vector<8x1xf32> to vector<8x8xf32>
    %257 = arith.subf %253, %256 : vector<8x8xf32>
    %258 = math.exp %257 : vector<8x8xf32>
    %cst_218 = arith.constant dense<0.000000e+00> : vector<8xf32>
    %259 = vector.multi_reduction <add>, %258, %cst_218 [1] : vector<8x8xf32> to vector<8xf32>
    %260 = vector.shape_cast %259 : vector<8xf32> to vector<8x1xf32>
    %261 = vector.broadcast %260 : vector<8x1xf32> to vector<8x8xf32>
    %262 = arith.divf %258, %261 : vector<8x8xf32>
    %cst_219 = arith.constant dense<0.000000e+00> : vector<8x8xf32>
    %263 = tpu.matmul %262, %250, %cst_219 {dimension_numbers = #tpu.dot_dimension_numbers<[1], [0], [0], [1], [0, 0, 1, 1], [], []>} : vector<8x8xf32>, vector<8x8xf32>, vector<8x8xf32> -> vector<8x8xf32>
    %c1_220 = arith.constant 1 : index
    %c0_221 = arith.constant 0 : index
    %c0_222 = arith.constant 0 : index
    %c0_223 = arith.constant 0 : index
    %264 = vector.load %arg8[%c1_220, %c0_221, %c0_222, %c0_223] : memref<2x4x8x32xf32, #tpu.memory_space<vmem>>, vector<1x1x8x32xf32>
    %265 = vector.shape_cast %264 : vector<1x1x8x32xf32> to vector<8x32xf32>
    %cst_224 = arith.constant dense<0.000000e+00> : vector<8x32xf32>
    %266 = tpu.matmul %263, %265, %cst_224 {dimension_numbers = #tpu.dot_dimension_numbers<[1], [0], [0], [1], [0, 0, 1, 1], [], []>} : vector<8x8xf32>, vector<8x32xf32>, vector<8x32xf32> -> vector<8x32xf32>
    %267 = arith.addf %229, %266 : vector<8x32xf32>
    %c1_225 = arith.constant 1 : index
    %c1_226 = arith.constant 1 : index
    %c0_227 = arith.constant 0 : index
    %c0_228 = arith.constant 0 : index
    %268 = vector.load %arg2[%c1_225, %c1_226, %c0_227, %c0_228] : memref<2x4x32x8xf32, #tpu.memory_space<vmem>>, vector<1x1x32x8xf32>
    %269 = vector.shape_cast %268 : vector<1x1x32x8xf32> to vector<32x8xf32>
    %cst_229 = arith.constant dense<0.000000e+00> : vector<8x8xf32>
    %270 = tpu.matmul %228, %269, %cst_229 {dimension_numbers = #tpu.dot_dimension_numbers<[1], [0], [0], [1], [0, 0, 1, 1], [], []>} : vector<8x32xf32>, vector<32x8xf32>, vector<8x8xf32> -> vector<8x8xf32>
    %c1_230 = arith.constant 1 : index
    %c1_231 = arith.constant 1 : index
    %c0_232 = arith.constant 0 : index
    %c0_233 = arith.constant 0 : index
    %271 = vector.load %arg5[%c1_230, %c1_231, %c0_232, %c0_233] : memref<2x4x1x8xf32, #tpu.memory_space<vmem>>, vector<1x1x1x8xf32>
    %272 = vector.shape_cast %271 : vector<1x1x1x8xf32> to vector<1x8xf32>
    %273 = vector.broadcast %272 : vector<1x8xf32> to vector<8x8xf32>
    %274 = arith.addf %270, %273 : vector<8x8xf32>
    %c1_234 = arith.constant 1 : index
    %c1_235 = arith.constant 1 : index
    %c0_236 = arith.constant 0 : index
    %c0_237 = arith.constant 0 : index
    %275 = vector.load %arg3[%c1_234, %c1_235, %c0_236, %c0_237] : memref<2x4x32x8xf32, #tpu.memory_space<vmem>>, vector<1x1x32x8xf32>
    %276 = vector.shape_cast %275 : vector<1x1x32x8xf32> to vector<32x8xf32>
    %cst_238 = arith.constant dense<0.000000e+00> : vector<8x8xf32>
    %277 = tpu.matmul %228, %276, %cst_238 {dimension_numbers = #tpu.dot_dimension_numbers<[1], [0], [0], [1], [0, 0, 1, 1], [], []>} : vector<8x32xf32>, vector<32x8xf32>, vector<8x8xf32> -> vector<8x8xf32>
    %c1_239 = arith.constant 1 : index
    %c1_240 = arith.constant 1 : index
    %c0_241 = arith.constant 0 : index
    %c0_242 = arith.constant 0 : index
    %278 = vector.load %arg6[%c1_239, %c1_240, %c0_241, %c0_242] : memref<2x4x1x8xf32, #tpu.memory_space<vmem>>, vector<1x1x1x8xf32>
    %279 = vector.shape_cast %278 : vector<1x1x1x8xf32> to vector<1x8xf32>
    %280 = vector.broadcast %279 : vector<1x8xf32> to vector<8x8xf32>
    %281 = arith.addf %277, %280 : vector<8x8xf32>
    %c1_243 = arith.constant 1 : index
    %c1_244 = arith.constant 1 : index
    %c0_245 = arith.constant 0 : index
    %c0_246 = arith.constant 0 : index
    %282 = vector.load %arg4[%c1_243, %c1_244, %c0_245, %c0_246] : memref<2x4x32x8xf32, #tpu.memory_space<vmem>>, vector<1x1x32x8xf32>
    %283 = vector.shape_cast %282 : vector<1x1x32x8xf32> to vector<32x8xf32>
    %cst_247 = arith.constant dense<0.000000e+00> : vector<8x8xf32>
    %284 = tpu.matmul %228, %283, %cst_247 {dimension_numbers = #tpu.dot_dimension_numbers<[1], [0], [0], [1], [0, 0, 1, 1], [], []>} : vector<8x32xf32>, vector<32x8xf32>, vector<8x8xf32> -> vector<8x8xf32>
    %c1_248 = arith.constant 1 : index
    %c1_249 = arith.constant 1 : index
    %c0_250 = arith.constant 0 : index
    %c0_251 = arith.constant 0 : index
    %285 = vector.load %arg7[%c1_248, %c1_249, %c0_250, %c0_251] : memref<2x4x1x8xf32, #tpu.memory_space<vmem>>, vector<1x1x1x8xf32>
    %286 = vector.shape_cast %285 : vector<1x1x1x8xf32> to vector<1x8xf32>
    %287 = vector.broadcast %286 : vector<1x8xf32> to vector<8x8xf32>
    %288 = arith.addf %284, %287 : vector<8x8xf32>
    %cst_252 = arith.constant dense<0.000000e+00> : vector<8x8xf32>
    %289 = tpu.matmul %274, %281, %cst_252 {dimension_numbers = #tpu.dot_dimension_numbers<[1], [1], [0], [0], [0, 0, 1, 0], [], []>} : vector<8x8xf32>, vector<8x8xf32>, vector<8x8xf32> -> vector<8x8xf32>
    %cst_253 = arith.constant 0.353553385 : f32
    %290 = vector.broadcast %cst_253 : f32 to vector<8x8xf32>
    %291 = arith.mulf %289, %290 : vector<8x8xf32>
    %cst_254 = arith.constant dense<0xFF800000> : vector<8xf32>
    %292 = vector.multi_reduction <maximumf>, %291, %cst_254 [1] : vector<8x8xf32> to vector<8xf32>
    %293 = vector.shape_cast %292 : vector<8xf32> to vector<8x1xf32>
    %294 = vector.broadcast %293 : vector<8x1xf32> to vector<8x8xf32>
    %295 = arith.subf %291, %294 : vector<8x8xf32>
    %296 = math.exp %295 : vector<8x8xf32>
    %cst_255 = arith.constant dense<0.000000e+00> : vector<8xf32>
    %297 = vector.multi_reduction <add>, %296, %cst_255 [1] : vector<8x8xf32> to vector<8xf32>
    %298 = vector.shape_cast %297 : vector<8xf32> to vector<8x1xf32>
    %299 = vector.broadcast %298 : vector<8x1xf32> to vector<8x8xf32>
    %300 = arith.divf %296, %299 : vector<8x8xf32>
    %cst_256 = arith.constant dense<0.000000e+00> : vector<8x8xf32>
    %301 = tpu.matmul %300, %288, %cst_256 {dimension_numbers = #tpu.dot_dimension_numbers<[1], [0], [0], [1], [0, 0, 1, 1], [], []>} : vector<8x8xf32>, vector<8x8xf32>, vector<8x8xf32> -> vector<8x8xf32>
    %c1_257 = arith.constant 1 : index
    %c1_258 = arith.constant 1 : index
    %c0_259 = arith.constant 0 : index
    %c0_260 = arith.constant 0 : index
    %302 = vector.load %arg8[%c1_257, %c1_258, %c0_259, %c0_260] : memref<2x4x8x32xf32, #tpu.memory_space<vmem>>, vector<1x1x8x32xf32>
    %303 = vector.shape_cast %302 : vector<1x1x8x32xf32> to vector<8x32xf32>
    %cst_261 = arith.constant dense<0.000000e+00> : vector<8x32xf32>
    %304 = tpu.matmul %301, %303, %cst_261 {dimension_numbers = #tpu.dot_dimension_numbers<[1], [0], [0], [1], [0, 0, 1, 1], [], []>} : vector<8x8xf32>, vector<8x32xf32>, vector<8x32xf32> -> vector<8x32xf32>
    %305 = arith.addf %267, %304 : vector<8x32xf32>
    %c1_262 = arith.constant 1 : index
    %c2_263 = arith.constant 2 : index
    %c0_264 = arith.constant 0 : index
    %c0_265 = arith.constant 0 : index
    %306 = vector.load %arg2[%c1_262, %c2_263, %c0_264, %c0_265] : memref<2x4x32x8xf32, #tpu.memory_space<vmem>>, vector<1x1x32x8xf32>
    %307 = vector.shape_cast %306 : vector<1x1x32x8xf32> to vector<32x8xf32>
    %cst_266 = arith.constant dense<0.000000e+00> : vector<8x8xf32>
    %308 = tpu.matmul %228, %307, %cst_266 {dimension_numbers = #tpu.dot_dimension_numbers<[1], [0], [0], [1], [0, 0, 1, 1], [], []>} : vector<8x32xf32>, vector<32x8xf32>, vector<8x8xf32> -> vector<8x8xf32>
    %c1_267 = arith.constant 1 : index
    %c2_268 = arith.constant 2 : index
    %c0_269 = arith.constant 0 : index
    %c0_270 = arith.constant 0 : index
    %309 = vector.load %arg5[%c1_267, %c2_268, %c0_269, %c0_270] : memref<2x4x1x8xf32, #tpu.memory_space<vmem>>, vector<1x1x1x8xf32>
    %310 = vector.shape_cast %309 : vector<1x1x1x8xf32> to vector<1x8xf32>
    %311 = vector.broadcast %310 : vector<1x8xf32> to vector<8x8xf32>
    %312 = arith.addf %308, %311 : vector<8x8xf32>
    %c1_271 = arith.constant 1 : index
    %c2_272 = arith.constant 2 : index
    %c0_273 = arith.constant 0 : index
    %c0_274 = arith.constant 0 : index
    %313 = vector.load %arg3[%c1_271, %c2_272, %c0_273, %c0_274] : memref<2x4x32x8xf32, #tpu.memory_space<vmem>>, vector<1x1x32x8xf32>
    %314 = vector.shape_cast %313 : vector<1x1x32x8xf32> to vector<32x8xf32>
    %cst_275 = arith.constant dense<0.000000e+00> : vector<8x8xf32>
    %315 = tpu.matmul %228, %314, %cst_275 {dimension_numbers = #tpu.dot_dimension_numbers<[1], [0], [0], [1], [0, 0, 1, 1], [], []>} : vector<8x32xf32>, vector<32x8xf32>, vector<8x8xf32> -> vector<8x8xf32>
    %c1_276 = arith.constant 1 : index
    %c2_277 = arith.constant 2 : index
    %c0_278 = arith.constant 0 : index
    %c0_279 = arith.constant 0 : index
    %316 = vector.load %arg6[%c1_276, %c2_277, %c0_278, %c0_279] : memref<2x4x1x8xf32, #tpu.memory_space<vmem>>, vector<1x1x1x8xf32>
    %317 = vector.shape_cast %316 : vector<1x1x1x8xf32> to vector<1x8xf32>
    %318 = vector.broadcast %317 : vector<1x8xf32> to vector<8x8xf32>
    %319 = arith.addf %315, %318 : vector<8x8xf32>
    %c1_280 = arith.constant 1 : index
    %c2_281 = arith.constant 2 : index
    %c0_282 = arith.constant 0 : index
    %c0_283 = arith.constant 0 : index
    %320 = vector.load %arg4[%c1_280, %c2_281, %c0_282, %c0_283] : memref<2x4x32x8xf32, #tpu.memory_space<vmem>>, vector<1x1x32x8xf32>
    %321 = vector.shape_cast %320 : vector<1x1x32x8xf32> to vector<32x8xf32>
    %cst_284 = arith.constant dense<0.000000e+00> : vector<8x8xf32>
    %322 = tpu.matmul %228, %321, %cst_284 {dimension_numbers = #tpu.dot_dimension_numbers<[1], [0], [0], [1], [0, 0, 1, 1], [], []>} : vector<8x32xf32>, vector<32x8xf32>, vector<8x8xf32> -> vector<8x8xf32>
    %c1_285 = arith.constant 1 : index
    %c2_286 = arith.constant 2 : index
    %c0_287 = arith.constant 0 : index
    %c0_288 = arith.constant 0 : index
    %323 = vector.load %arg7[%c1_285, %c2_286, %c0_287, %c0_288] : memref<2x4x1x8xf32, #tpu.memory_space<vmem>>, vector<1x1x1x8xf32>
    %324 = vector.shape_cast %323 : vector<1x1x1x8xf32> to vector<1x8xf32>
    %325 = vector.broadcast %324 : vector<1x8xf32> to vector<8x8xf32>
    %326 = arith.addf %322, %325 : vector<8x8xf32>
    %cst_289 = arith.constant dense<0.000000e+00> : vector<8x8xf32>
    %327 = tpu.matmul %312, %319, %cst_289 {dimension_numbers = #tpu.dot_dimension_numbers<[1], [1], [0], [0], [0, 0, 1, 0], [], []>} : vector<8x8xf32>, vector<8x8xf32>, vector<8x8xf32> -> vector<8x8xf32>
    %cst_290 = arith.constant 0.353553385 : f32
    %328 = vector.broadcast %cst_290 : f32 to vector<8x8xf32>
    %329 = arith.mulf %327, %328 : vector<8x8xf32>
    %cst_291 = arith.constant dense<0xFF800000> : vector<8xf32>
    %330 = vector.multi_reduction <maximumf>, %329, %cst_291 [1] : vector<8x8xf32> to vector<8xf32>
    %331 = vector.shape_cast %330 : vector<8xf32> to vector<8x1xf32>
    %332 = vector.broadcast %331 : vector<8x1xf32> to vector<8x8xf32>
    %333 = arith.subf %329, %332 : vector<8x8xf32>
    %334 = math.exp %333 : vector<8x8xf32>
    %cst_292 = arith.constant dense<0.000000e+00> : vector<8xf32>
    %335 = vector.multi_reduction <add>, %334, %cst_292 [1] : vector<8x8xf32> to vector<8xf32>
    %336 = vector.shape_cast %335 : vector<8xf32> to vector<8x1xf32>
    %337 = vector.broadcast %336 : vector<8x1xf32> to vector<8x8xf32>
    %338 = arith.divf %334, %337 : vector<8x8xf32>
    %cst_293 = arith.constant dense<0.000000e+00> : vector<8x8xf32>
    %339 = tpu.matmul %338, %326, %cst_293 {dimension_numbers = #tpu.dot_dimension_numbers<[1], [0], [0], [1], [0, 0, 1, 1], [], []>} : vector<8x8xf32>, vector<8x8xf32>, vector<8x8xf32> -> vector<8x8xf32>
    %c1_294 = arith.constant 1 : index
    %c2_295 = arith.constant 2 : index
    %c0_296 = arith.constant 0 : index
    %c0_297 = arith.constant 0 : index
    %340 = vector.load %arg8[%c1_294, %c2_295, %c0_296, %c0_297] : memref<2x4x8x32xf32, #tpu.memory_space<vmem>>, vector<1x1x8x32xf32>
    %341 = vector.shape_cast %340 : vector<1x1x8x32xf32> to vector<8x32xf32>
    %cst_298 = arith.constant dense<0.000000e+00> : vector<8x32xf32>
    %342 = tpu.matmul %339, %341, %cst_298 {dimension_numbers = #tpu.dot_dimension_numbers<[1], [0], [0], [1], [0, 0, 1, 1], [], []>} : vector<8x8xf32>, vector<8x32xf32>, vector<8x32xf32> -> vector<8x32xf32>
    %343 = arith.addf %305, %342 : vector<8x32xf32>
    %c1_299 = arith.constant 1 : index
    %c3_300 = arith.constant 3 : index
    %c0_301 = arith.constant 0 : index
    %c0_302 = arith.constant 0 : index
    %344 = vector.load %arg2[%c1_299, %c3_300, %c0_301, %c0_302] : memref<2x4x32x8xf32, #tpu.memory_space<vmem>>, vector<1x1x32x8xf32>
    %345 = vector.shape_cast %344 : vector<1x1x32x8xf32> to vector<32x8xf32>
    %cst_303 = arith.constant dense<0.000000e+00> : vector<8x8xf32>
    %346 = tpu.matmul %228, %345, %cst_303 {dimension_numbers = #tpu.dot_dimension_numbers<[1], [0], [0], [1], [0, 0, 1, 1], [], []>} : vector<8x32xf32>, vector<32x8xf32>, vector<8x8xf32> -> vector<8x8xf32>
    %c1_304 = arith.constant 1 : index
    %c3_305 = arith.constant 3 : index
    %c0_306 = arith.constant 0 : index
    %c0_307 = arith.constant 0 : index
    %347 = vector.load %arg5[%c1_304, %c3_305, %c0_306, %c0_307] : memref<2x4x1x8xf32, #tpu.memory_space<vmem>>, vector<1x1x1x8xf32>
    %348 = vector.shape_cast %347 : vector<1x1x1x8xf32> to vector<1x8xf32>
    %349 = vector.broadcast %348 : vector<1x8xf32> to vector<8x8xf32>
    %350 = arith.addf %346, %349 : vector<8x8xf32>
    %c1_308 = arith.constant 1 : index
    %c3_309 = arith.constant 3 : index
    %c0_310 = arith.constant 0 : index
    %c0_311 = arith.constant 0 : index
    %351 = vector.load %arg3[%c1_308, %c3_309, %c0_310, %c0_311] : memref<2x4x32x8xf32, #tpu.memory_space<vmem>>, vector<1x1x32x8xf32>
    %352 = vector.shape_cast %351 : vector<1x1x32x8xf32> to vector<32x8xf32>
    %cst_312 = arith.constant dense<0.000000e+00> : vector<8x8xf32>
    %353 = tpu.matmul %228, %352, %cst_312 {dimension_numbers = #tpu.dot_dimension_numbers<[1], [0], [0], [1], [0, 0, 1, 1], [], []>} : vector<8x32xf32>, vector<32x8xf32>, vector<8x8xf32> -> vector<8x8xf32>
    %c1_313 = arith.constant 1 : index
    %c3_314 = arith.constant 3 : index
    %c0_315 = arith.constant 0 : index
    %c0_316 = arith.constant 0 : index
    %354 = vector.load %arg6[%c1_313, %c3_314, %c0_315, %c0_316] : memref<2x4x1x8xf32, #tpu.memory_space<vmem>>, vector<1x1x1x8xf32>
    %355 = vector.shape_cast %354 : vector<1x1x1x8xf32> to vector<1x8xf32>
    %356 = vector.broadcast %355 : vector<1x8xf32> to vector<8x8xf32>
    %357 = arith.addf %353, %356 : vector<8x8xf32>
    %c1_317 = arith.constant 1 : index
    %c3_318 = arith.constant 3 : index
    %c0_319 = arith.constant 0 : index
    %c0_320 = arith.constant 0 : index
    %358 = vector.load %arg4[%c1_317, %c3_318, %c0_319, %c0_320] : memref<2x4x32x8xf32, #tpu.memory_space<vmem>>, vector<1x1x32x8xf32>
    %359 = vector.shape_cast %358 : vector<1x1x32x8xf32> to vector<32x8xf32>
    %cst_321 = arith.constant dense<0.000000e+00> : vector<8x8xf32>
    %360 = tpu.matmul %228, %359, %cst_321 {dimension_numbers = #tpu.dot_dimension_numbers<[1], [0], [0], [1], [0, 0, 1, 1], [], []>} : vector<8x32xf32>, vector<32x8xf32>, vector<8x8xf32> -> vector<8x8xf32>
    %c1_322 = arith.constant 1 : index
    %c3_323 = arith.constant 3 : index
    %c0_324 = arith.constant 0 : index
    %c0_325 = arith.constant 0 : index
    %361 = vector.load %arg7[%c1_322, %c3_323, %c0_324, %c0_325] : memref<2x4x1x8xf32, #tpu.memory_space<vmem>>, vector<1x1x1x8xf32>
    %362 = vector.shape_cast %361 : vector<1x1x1x8xf32> to vector<1x8xf32>
    %363 = vector.broadcast %362 : vector<1x8xf32> to vector<8x8xf32>
    %364 = arith.addf %360, %363 : vector<8x8xf32>
    %cst_326 = arith.constant dense<0.000000e+00> : vector<8x8xf32>
    %365 = tpu.matmul %350, %357, %cst_326 {dimension_numbers = #tpu.dot_dimension_numbers<[1], [1], [0], [0], [0, 0, 1, 0], [], []>} : vector<8x8xf32>, vector<8x8xf32>, vector<8x8xf32> -> vector<8x8xf32>
    %cst_327 = arith.constant 0.353553385 : f32
    %366 = vector.broadcast %cst_327 : f32 to vector<8x8xf32>
    %367 = arith.mulf %365, %366 : vector<8x8xf32>
    %cst_328 = arith.constant dense<0xFF800000> : vector<8xf32>
    %368 = vector.multi_reduction <maximumf>, %367, %cst_328 [1] : vector<8x8xf32> to vector<8xf32>
    %369 = vector.shape_cast %368 : vector<8xf32> to vector<8x1xf32>
    %370 = vector.broadcast %369 : vector<8x1xf32> to vector<8x8xf32>
    %371 = arith.subf %367, %370 : vector<8x8xf32>
    %372 = math.exp %371 : vector<8x8xf32>
    %cst_329 = arith.constant dense<0.000000e+00> : vector<8xf32>
    %373 = vector.multi_reduction <add>, %372, %cst_329 [1] : vector<8x8xf32> to vector<8xf32>
    %374 = vector.shape_cast %373 : vector<8xf32> to vector<8x1xf32>
    %375 = vector.broadcast %374 : vector<8x1xf32> to vector<8x8xf32>
    %376 = arith.divf %372, %375 : vector<8x8xf32>
    %cst_330 = arith.constant dense<0.000000e+00> : vector<8x8xf32>
    %377 = tpu.matmul %376, %364, %cst_330 {dimension_numbers = #tpu.dot_dimension_numbers<[1], [0], [0], [1], [0, 0, 1, 1], [], []>} : vector<8x8xf32>, vector<8x8xf32>, vector<8x8xf32> -> vector<8x8xf32>
    %c1_331 = arith.constant 1 : index
    %c3_332 = arith.constant 3 : index
    %c0_333 = arith.constant 0 : index
    %c0_334 = arith.constant 0 : index
    %378 = vector.load %arg8[%c1_331, %c3_332, %c0_333, %c0_334] : memref<2x4x8x32xf32, #tpu.memory_space<vmem>>, vector<1x1x8x32xf32>
    %379 = vector.shape_cast %378 : vector<1x1x8x32xf32> to vector<8x32xf32>
    %cst_335 = arith.constant dense<0.000000e+00> : vector<8x32xf32>
    %380 = tpu.matmul %377, %379, %cst_335 {dimension_numbers = #tpu.dot_dimension_numbers<[1], [0], [0], [1], [0, 0, 1, 1], [], []>} : vector<8x8xf32>, vector<8x32xf32>, vector<8x32xf32> -> vector<8x32xf32>
    %381 = arith.addf %343, %380 : vector<8x32xf32>
    %382 = arith.addf %228, %381 : vector<8x32xf32>
    %c1_336 = arith.constant 1 : index
    %c0_337 = arith.constant 0 : index
    %c0_338 = arith.constant 0 : index
    %383 = vector.load %arg9[%c1_336, %c0_337, %c0_338] : memref<2x1x32xf32, #tpu.memory_space<vmem>>, vector<1x1x32xf32>
    %384 = vector.shape_cast %383 : vector<1x1x32xf32> to vector<1x32xf32>
    %385 = vector.broadcast %384 : vector<1x32xf32> to vector<8x32xf32>
    %386 = arith.addf %382, %385 : vector<8x32xf32>
    %c1_339 = arith.constant 1 : index
    %c0_340 = arith.constant 0 : index
    %c0_341 = arith.constant 0 : index
    %387 = vector.load %arg10[%c1_339, %c0_340, %c0_341] : memref<2x1x32xf32, #tpu.memory_space<vmem>>, vector<1x1x32xf32>
    %388 = vector.shape_cast %387 : vector<1x1x32xf32> to vector<1x32xf32>
    %c1_342 = arith.constant 1 : index
    %c0_343 = arith.constant 0 : index
    %c0_344 = arith.constant 0 : index
    %389 = vector.load %arg11[%c1_342, %c0_343, %c0_344] : memref<2x1x32xf32, #tpu.memory_space<vmem>>, vector<1x1x32xf32>
    %390 = vector.shape_cast %389 : vector<1x1x32xf32> to vector<1x32xf32>
    %cst_345 = arith.constant dense<0.000000e+00> : vector<8xf32>
    %391 = vector.multi_reduction <add>, %386, %cst_345 [1] : vector<8x32xf32> to vector<8xf32>
    %392 = vector.shape_cast %391 : vector<8xf32> to vector<8x1xf32>
    %cst_346 = arith.constant 3.200000e+01 : f32
    %393 = vector.broadcast %cst_346 : f32 to vector<8x1xf32>
    %394 = arith.divf %392, %393 : vector<8x1xf32>
    %395 = vector.broadcast %394 : vector<8x1xf32> to vector<8x32xf32>
    %396 = arith.subf %386, %395 : vector<8x32xf32>
    %397 = arith.mulf %396, %396 : vector<8x32xf32>
    %cst_347 = arith.constant dense<0.000000e+00> : vector<8xf32>
    %398 = vector.multi_reduction <add>, %397, %cst_347 [1] : vector<8x32xf32> to vector<8xf32>
    %399 = vector.shape_cast %398 : vector<8xf32> to vector<8x1xf32>
    %cst_348 = arith.constant 3.200000e+01 : f32
    %400 = vector.broadcast %cst_348 : f32 to vector<8x1xf32>
    %401 = arith.divf %399, %400 : vector<8x1xf32>
    %402 = vector.broadcast %394 : vector<8x1xf32> to vector<8x32xf32>
    %403 = arith.subf %386, %402 : vector<8x32xf32>
    %cst_349 = arith.constant 9.99999974E-6 : f32
    %404 = vector.broadcast %cst_349 : f32 to vector<8x1xf32>
    %405 = arith.addf %401, %404 : vector<8x1xf32>
    %406 = math.rsqrt %405 : vector<8x1xf32>
    %407 = vector.broadcast %406 : vector<8x1xf32> to vector<8x32xf32>
    %408 = arith.mulf %403, %407 : vector<8x32xf32>
    %409 = vector.broadcast %388 : vector<1x32xf32> to vector<8x32xf32>
    %410 = arith.mulf %408, %409 : vector<8x32xf32>
    %411 = vector.broadcast %390 : vector<1x32xf32> to vector<8x32xf32>
    %412 = arith.addf %410, %411 : vector<8x32xf32>
    %c1_350 = arith.constant 1 : index
    %c0_351 = arith.constant 0 : index
    %c0_352 = arith.constant 0 : index
    %413 = vector.load %arg12[%c1_350, %c0_351, %c0_352] : memref<2x32x128xf32, #tpu.memory_space<vmem>>, vector<1x32x128xf32>
    %414 = vector.shape_cast %413 : vector<1x32x128xf32> to vector<32x128xf32>
    %cst_353 = arith.constant dense<0.000000e+00> : vector<8x128xf32>
    %415 = tpu.matmul %412, %414, %cst_353 {dimension_numbers = #tpu.dot_dimension_numbers<[1], [0], [0], [1], [0, 0, 1, 1], [], []>} : vector<8x32xf32>, vector<32x128xf32>, vector<8x128xf32> -> vector<8x128xf32>
    %c1_354 = arith.constant 1 : index
    %c0_355 = arith.constant 0 : index
    %c0_356 = arith.constant 0 : index
    %416 = vector.load %arg13[%c1_354, %c0_355, %c0_356] : memref<2x1x128xf32, #tpu.memory_space<vmem>>, vector<1x1x128xf32>
    %417 = vector.shape_cast %416 : vector<1x1x128xf32> to vector<1x128xf32>
    %418 = vector.broadcast %417 : vector<1x128xf32> to vector<8x128xf32>
    %419 = arith.addf %415, %418 : vector<8x128xf32>
    %cst_357 = arith.constant 0.000000e+00 : f32
    %420 = vector.broadcast %cst_357 : f32 to vector<8x128xf32>
    %421 = arith.maximumf %419, %420 : vector<8x128xf32>
    %c1_358 = arith.constant 1 : index
    %c0_359 = arith.constant 0 : index
    %c0_360 = arith.constant 0 : index
    %422 = vector.load %arg14[%c1_358, %c0_359, %c0_360] : memref<2x128x32xf32, #tpu.memory_space<vmem>>, vector<1x128x32xf32>
    %423 = vector.shape_cast %422 : vector<1x128x32xf32> to vector<128x32xf32>
    %cst_361 = arith.constant dense<0.000000e+00> : vector<8x32xf32>
    %424 = tpu.matmul %421, %423, %cst_361 {dimension_numbers = #tpu.dot_dimension_numbers<[1], [0], [0], [1], [0, 0, 1, 1], [], []>} : vector<8x128xf32>, vector<128x32xf32>, vector<8x32xf32> -> vector<8x32xf32>
    %c1_362 = arith.constant 1 : index
    %c0_363 = arith.constant 0 : index
    %c0_364 = arith.constant 0 : index
    %425 = vector.load %arg15[%c1_362, %c0_363, %c0_364] : memref<2x1x32xf32, #tpu.memory_space<vmem>>, vector<1x1x32xf32>
    %426 = vector.shape_cast %425 : vector<1x1x32xf32> to vector<1x32xf32>
    %427 = vector.broadcast %426 : vector<1x32xf32> to vector<8x32xf32>
    %428 = arith.addf %424, %427 : vector<8x32xf32>
    %429 = arith.addf %412, %428 : vector<8x32xf32>
    %c1_365 = arith.constant 1 : index
    %c0_366 = arith.constant 0 : index
    %c0_367 = arith.constant 0 : index
    %430 = vector.load %arg16[%c1_365, %c0_366, %c0_367] : memref<2x1x32xf32, #tpu.memory_space<vmem>>, vector<1x1x32xf32>
    %431 = vector.shape_cast %430 : vector<1x1x32xf32> to vector<1x32xf32>
    %c1_368 = arith.constant 1 : index
    %c0_369 = arith.constant 0 : index
    %c0_370 = arith.constant 0 : index
    %432 = vector.load %arg17[%c1_368, %c0_369, %c0_370] : memref<2x1x32xf32, #tpu.memory_space<vmem>>, vector<1x1x32xf32>
    %433 = vector.shape_cast %432 : vector<1x1x32xf32> to vector<1x32xf32>
    %cst_371 = arith.constant dense<0.000000e+00> : vector<8xf32>
    %434 = vector.multi_reduction <add>, %429, %cst_371 [1] : vector<8x32xf32> to vector<8xf32>
    %435 = vector.shape_cast %434 : vector<8xf32> to vector<8x1xf32>
    %cst_372 = arith.constant 3.200000e+01 : f32
    %436 = vector.broadcast %cst_372 : f32 to vector<8x1xf32>
    %437 = arith.divf %435, %436 : vector<8x1xf32>
    %438 = vector.broadcast %437 : vector<8x1xf32> to vector<8x32xf32>
    %439 = arith.subf %429, %438 : vector<8x32xf32>
    %440 = arith.mulf %439, %439 : vector<8x32xf32>
    %cst_373 = arith.constant dense<0.000000e+00> : vector<8xf32>
    %441 = vector.multi_reduction <add>, %440, %cst_373 [1] : vector<8x32xf32> to vector<8xf32>
    %442 = vector.shape_cast %441 : vector<8xf32> to vector<8x1xf32>
    %cst_374 = arith.constant 3.200000e+01 : f32
    %443 = vector.broadcast %cst_374 : f32 to vector<8x1xf32>
    %444 = arith.divf %442, %443 : vector<8x1xf32>
    %445 = vector.broadcast %437 : vector<8x1xf32> to vector<8x32xf32>
    %446 = arith.subf %429, %445 : vector<8x32xf32>
    %cst_375 = arith.constant 9.99999974E-6 : f32
    %447 = vector.broadcast %cst_375 : f32 to vector<8x1xf32>
    %448 = arith.addf %444, %447 : vector<8x1xf32>
    %449 = math.rsqrt %448 : vector<8x1xf32>
    %450 = vector.broadcast %449 : vector<8x1xf32> to vector<8x32xf32>
    %451 = arith.mulf %446, %450 : vector<8x32xf32>
    %452 = vector.broadcast %431 : vector<1x32xf32> to vector<8x32xf32>
    %453 = arith.mulf %451, %452 : vector<8x32xf32>
    %454 = vector.broadcast %433 : vector<1x32xf32> to vector<8x32xf32>
    %455 = arith.addf %453, %454 : vector<8x32xf32>
    %c0_376 = arith.constant 0 : index
    %c0_377 = arith.constant 0 : index
    %c0_378 = arith.constant 0 : index
    %456 = vector.load %arg18[%c0_376, %c0_377, %c0_378] : memref<1x8x32xf32, #tpu.memory_space<vmem>>, vector<1x8x32xf32>
    %457 = vector.shape_cast %456 : vector<1x8x32xf32> to vector<8x32xf32>
    %458 = vector.shape_cast %455 : vector<8x32xf32> to vector<1x8x32xf32>
    tpu.vector_store %arg18[%c0_376, %c0_377, %c0_378], %458 {strides = array<i32>} : memref<1x8x32xf32, #tpu.memory_space<vmem>>, vector<1x8x32xf32>,
    return
  }
  func.func @transform_0(%arg0: i32) -> (i32, i32, i32) {
    %c0_i32 = arith.constant 0 : i32
    %c0_i32_0 = arith.constant 0 : i32
    %c0_i32_1 = arith.constant 0 : i32
    return %arg0, %c0_i32, %c0_i32_0 : i32, i32, i32
  }
  func.func @transform_1(%arg0: i32) -> (i32, i32, i32, i32) {
    %c0_i32 = arith.constant 0 : i32
    %c0_i32_0 = arith.constant 0 : i32
    %c0_i32_1 = arith.constant 0 : i32
    %c0_i32_2 = arith.constant 0 : i32
    %c0_i32_3 = arith.constant 0 : i32
    return %c0_i32, %c0_i32_0, %c0_i32_1, %c0_i32_2 : i32, i32, i32, i32
  }
  func.func @transform_2(%arg0: i32) -> (i32, i32, i32, i32) {
    %c0_i32 = arith.constant 0 : i32
    %c0_i32_0 = arith.constant 0 : i32
    %c0_i32_1 = arith.constant 0 : i32
    %c0_i32_2 = arith.constant 0 : i32
    %c0_i32_3 = arith.constant 0 : i32
    return %c0_i32, %c0_i32_0, %c0_i32_1, %c0_i32_2 : i32, i32, i32, i32
  }
  func.func @transform_3(%arg0: i32) -> (i32, i32, i32, i32) {
    %c0_i32 = arith.constant 0 : i32
    %c0_i32_0 = arith.constant 0 : i32
    %c0_i32_1 = arith.constant 0 : i32
    %c0_i32_2 = arith.constant 0 : i32
    %c0_i32_3 = arith.constant 0 : i32
    return %c0_i32, %c0_i32_0, %c0_i32_1, %c0_i32_2 : i32, i32, i32, i32
  }
  func.func @transform_4(%arg0: i32) -> (i32, i32, i32, i32) {
    %c0_i32 = arith.constant 0 : i32
    %c0_i32_0 = arith.constant 0 : i32
    %c0_i32_1 = arith.constant 0 : i32
    %c0_i32_2 = arith.constant 0 : i32
    %c0_i32_3 = arith.constant 0 : i32
    return %c0_i32, %c0_i32_0, %c0_i32_1, %c0_i32_2 : i32, i32, i32, i32
  }
  func.func @transform_5(%arg0: i32) -> (i32, i32, i32, i32) {
    %c0_i32 = arith.constant 0 : i32
    %c0_i32_0 = arith.constant 0 : i32
    %c0_i32_1 = arith.constant 0 : i32
    %c0_i32_2 = arith.constant 0 : i32
    %c0_i32_3 = arith.constant 0 : i32
    return %c0_i32, %c0_i32_0, %c0_i32_1, %c0_i32_2 : i32, i32, i32, i32
  }
  func.func @transform_6(%arg0: i32) -> (i32, i32, i32, i32) {
    %c0_i32 = arith.constant 0 : i32
    %c0_i32_0 = arith.constant 0 : i32
    %c0_i32_1 = arith.constant 0 : i32
    %c0_i32_2 = arith.constant 0 : i32
    %c0_i32_3 = arith.constant 0 : i32
    return %c0_i32, %c0_i32_0, %c0_i32_1, %c0_i32_2 : i32, i32, i32, i32
  }
  func.func @transform_7(%arg0: i32) -> (i32, i32, i32, i32) {
    %c0_i32 = arith.constant 0 : i32
    %c0_i32_0 = arith.constant 0 : i32
    %c0_i32_1 = arith.constant 0 : i32
    %c0_i32_2 = arith.constant 0 : i32
    %c0_i32_3 = arith.constant 0 : i32
    return %c0_i32, %c0_i32_0, %c0_i32_1, %c0_i32_2 : i32, i32, i32, i32
  }
  func.func @transform_8(%arg0: i32) -> (i32, i32, i32) {
    %c0_i32 = arith.constant 0 : i32
    %c0_i32_0 = arith.constant 0 : i32
    %c0_i32_1 = arith.constant 0 : i32
    %c0_i32_2 = arith.constant 0 : i32
    return %c0_i32, %c0_i32_0, %c0_i32_1 : i32, i32, i32
  }
  func.func @transform_9(%arg0: i32) -> (i32, i32, i32) {
    %c0_i32 = arith.constant 0 : i32
    %c0_i32_0 = arith.constant 0 : i32
    %c0_i32_1 = arith.constant 0 : i32
    %c0_i32_2 = arith.constant 0 : i32
    return %c0_i32, %c0_i32_0, %c0_i32_1 : i32, i32, i32
  }
  func.func @transform_10(%arg0: i32) -> (i32, i32, i32) {
    %c0_i32 = arith.constant 0 : i32
    %c0_i32_0 = arith.constant 0 : i32
    %c0_i32_1 = arith.constant 0 : i32
    %c0_i32_2 = arith.constant 0 : i32
    return %c0_i32, %c0_i32_0, %c0_i32_1 : i32, i32, i32
  }
  func.func @transform_11(%arg0: i32) -> (i32, i32, i32) {
    %c0_i32 = arith.constant 0 : i32
    %c0_i32_0 = arith.constant 0 : i32
    %c0_i32_1 = arith.constant 0 : i32
    %c0_i32_2 = arith.constant 0 : i32
    return %c0_i32, %c0_i32_0, %c0_i32_1 : i32, i32, i32
  }
  func.func @transform_12(%arg0: i32) -> (i32, i32, i32) {
    %c0_i32 = arith.constant 0 : i32
    %c0_i32_0 = arith.constant 0 : i32
    %c0_i32_1 = arith.constant 0 : i32
    %c0_i32_2 = arith.constant 0 : i32
    return %c0_i32, %c0_i32_0, %c0_i32_1 : i32, i32, i32
  }
  func.func @transform_13(%arg0: i32) -> (i32, i32, i32) {
    %c0_i32 = arith.constant 0 : i32
    %c0_i32_0 = arith.constant 0 : i32
    %c0_i32_1 = arith.constant 0 : i32
    %c0_i32_2 = arith.constant 0 : i32
    return %c0_i32, %c0_i32_0, %c0_i32_1 : i32, i32, i32
  }
  func.func @transform_14(%arg0: i32) -> (i32, i32, i32) {
    %c0_i32 = arith.constant 0 : i32
    %c0_i32_0 = arith.constant 0 : i32
    %c0_i32_1 = arith.constant 0 : i32
    %c0_i32_2 = arith.constant 0 : i32
    return %c0_i32, %c0_i32_0, %c0_i32_1 : i32, i32, i32
  }
  func.func @transform_15(%arg0: i32) -> (i32, i32, i32) {
    %c0_i32 = arith.constant 0 : i32
    %c0_i32_0 = arith.constant 0 : i32
    %c0_i32_1 = arith.constant 0 : i32
    %c0_i32_2 = arith.constant 0 : i32
    return %c0_i32, %c0_i32_0, %c0_i32_1 : i32, i32, i32
  }
  func.func @transform_16(%arg0: i32) -> (i32, i32, i32) {
    %c0_i32 = arith.constant 0 : i32
    %c0_i32_0 = arith.constant 0 : i32
    %c0_i32_1 = arith.constant 0 : i32
    %c0_i32_2 = arith.constant 0 : i32
    return %c0_i32, %c0_i32_0, %c0_i32_1 : i32, i32, i32
  }
  func.func @transform_17(%arg0: i32) -> (i32, i32, i32) {
    %c0_i32 = arith.constant 0 : i32
    %c0_i32_0 = arith.constant 0 : i32
    %c0_i32_1 = arith.constant 0 : i32
    return %arg0, %c0_i32, %c0_i32_0 : i32, i32, i32
  }
}

</mosaic_0001>

<bundles_post_ra>
// kernel: fused_transformer_encoder.1
= control target key start
LH: loop header
LB: loop body
LE: loop exit
PB: predicated region body
PF: predicated region fallthrough
CT: control target
= control target key end

     0   :  { %s3679_s0 = inlined_call_operand.vmem [shape: f32[2,8,32], index: 0, kind: input, shape index: {}]   ;;  %s3680_s1 = inlined_call_operand.vmem [shape: f32[2,4,32,8], index: 1, kind: input, shape index: {}]   ;;  %s3681_s2 = inlined_call_operand.vmem [shape: f32[2,4,32,8], index: 2, kind: input, shape index: {}]   ;;  %s3682_s3 = inlined_call_operand.vmem [shape: f32[2,4,32,8], index: 3, kind: input, shape index: {}]   ;;  %s3683_s4 = inlined_call_operand.vmem [shape: f32[2,4,1,8], index: 4, kind: input, shape index: {}]   ;;  %s3684_s5 = inlined_call_operand.vmem [shape: f32[2,4,1,8], index: 5, kind: input, shape index: {}]   ;;  %s3685_s6 = inlined_call_operand.vmem [shape: f32[2,4,1,8], index: 6, kind: input, shape index: {}]   ;;  %s3686_s7 = inlined_call_operand.vmem [shape: f32[2,4,8,32], index: 7, kind: input, shape index: {}]   ;;  %s3687_s8 = inlined_call_operand.vmem [shape: f32[2,1,32], index: 8, kind: input, shape index: {}]   ;;  %s3688_s9 = inlined_call_operand.vmem [shape: f32[2,1,32], index: 9, kind: input, shape index: {}]   ;;  %s3689_s10 = inlined_call_operand.vmem [shape: f32[2,1,32], index: 10, kind: input, shape index: {}]   ;;  %s3690_s11 = inlined_call_operand.vmem [shape: f32[2,32,128], index: 11, kind: input, shape index: {}]   ;;  %s3691_s12 = inlined_call_operand.vmem [shape: f32[2,1,128], index: 12, kind: input, shape index: {}]   ;;  %s3692_s13 = inlined_call_operand.vmem [shape: f32[2,128,32], index: 13, kind: input, shape index: {}]   ;;  %s3693_s14 = inlined_call_operand.vmem [shape: f32[2,1,32], index: 14, kind: input, shape index: {}]   ;;  %s3694_s15 = inlined_call_operand.vmem [shape: f32[2,1,32], index: 15, kind: input, shape index: {}]   ;;  %s3695_s16 = inlined_call_operand.vmem [shape: f32[2,1,32], index: 16, kind: input, shape index: {}]   ;;  %s3696_s17 = inlined_call_operand.hbm [shape: f32[2,8,32], index: 17, kind: output, shape index: {}]  }
   0x1   :  { %3704 = sst [smem:[#allocation11_spill]] %s3679_s0 }
   0x2   :  { %3705 = sst [smem:[#allocation12_spill]] %s3680_s1 }
   0x3   :  { %3706 = sst [smem:[#allocation13_spill]] %s3681_s2 }
   0x4   :  { %3707 = sst [smem:[#allocation14_spill]] %s3682_s3 }
   0x5   :  { %22 = vsyncpa [#allocation3], 0 }
   0x6   :  { %24 = vsyncpa [#allocation3 + $0x1], 0  ;;  %s2922_s24 = smov 0   ;;  %s2924_s25 = smov 0  }
   0x7   :  { %s2926_s26 = smov 0   ;;  %s2928_s27 = smov 0  }
   0x8 LB: > { %3708 = sst [smem:[#allocation5_spill]] %s2817_s24  ;;  %s2943_s28 = sadd.s32 4294967295, %s2829_s27   ;;  %s2829_s27 = sphi %s2928_s27, %s3723_s27   ;;  %s2825_s26 = sphi %s2926_s26, %s3728_s26   ;;  %s2821_s25 = sphi %s2924_s25, %s3727_s25   ;;  %s2817_s24 = sphi %s2922_s24, %s3726_s24  }
   0x9   : > { %3709 = sst [smem:[#allocation6_spill]] %s2825_s26  ;;  %s2440_s29 = sadd.s32 4294967294, %s2829_s27  }
   0xa   : > { %3710 = sst [smem:[#allocation7_spill]] %s2829_s27  ;;  %s2947_s0 = sadd.s32 1, %s2829_s27  }
   0xb   : > { %3711 = sst [smem:[#allocation8_spill]] %s2947_s0  ;;  %s399_s30 = sadd.s32 1, %s2825_s26 }
   0xc   : > { %s396_s18 = ssub.s32 %s2829_s27, %s2947_s0  ;;  %p409_p0 = scmp.ne.s32.totalorder %s2825_s26, %s2821_s25 }
   0xd   : > { %p397_p1 = scmp.eq.s32.totalorder %s396_s18, 0  ;;  %p410_p2 = scmp.eq.s32.totalorder %s2943_s28, 1 }
   0xe   : > { %p415_p3 = scmp.ne.s32.totalorder %s2821_s25, %s2817_s24  ;;  %p416_p4 = scmp.eq.s32.totalorder %s2440_s29, 1 }
   0xf   : > { %s2958_s19 = scalar_select %p397_p1, %s2825_s26, %s399_s30  }
  0x10   : > { %p2960_p5 = por %p410_p2, %p409_p0  ;;  %p2964_p6 = por %p416_p4, %p415_p3 }
  0x11   : > { %3712 = sst [smem:[#allocation9_spill]] %s2958_s19  ;;  %p2443_p7 = scmp.ge.s32.totalorder %s2829_s27, 1 }
  0x12   : > { %s3714_s20 = scalar_select %p2964_p6, 1, 0 }
  0x13   : > { %p489_p8 = scmp.lt.s32.totalorder %s2829_s27, 3 }
  0x14   : > { %3715 = sst [smem:[#allocation10_spill]] %s3714_s20 }
  0x15   : > { %p490_p9 = pnand %p2443_p7, %p489_p8 }
  0x16   : > { %s3716_s2 = sld [smem:[#allocation13_spill]] (!%p490_p9)  ;;  %p540_p10 = scmp.lt.s32.totalorder (!%p490_p9), %s2943_s28, 1 }
  0x17   : > { %493 = sbr.rel (%p490_p9) target bundleno = 6055 (0x17a7), region = 88  ;;  %s3717_s19 = sld [smem:[#allocation12_spill]] (!%p490_p9) }
  0x18   : > { %s3718_s18 = sld [smem:[#allocation11_spill]] (!%p490_p9)  ;;  %s537_s29 = sand.u32 (!%p490_p9), 1, %s2821_s25  }
  0x19   : > { %s3719_s3 = sld [smem:[#allocation14_spill]] (!%p490_p9)  ;;  %s2644_s26 = sshll.u32 (!%p490_p9), %s2943_s28, 3 }
  0x1a   : > { %s2366_s0 = scalar_lea.sflag (!%p490_p9), [#allocation3], %s537_s29 }
  0x1c   : > { %v580_v0 = vld [vmem:[%s3716_s2 + $0x18] sm:$0xff]  ;;  %v579_v1 = vld [vmem:[%s3716_s2 + $0x10] sm:$0xff]  ;;  %v578_v4 = vld [vmem:[%s3716_s2 + $0x8] sm:$0xff]  ;;  %s541_s23 = scalar_select %p540_p10, %s2943_s28, 1  ;;  %vm553_vm0 = vcmask 261120   ;;  %vm633_vm1 = vcmask 64512  }
  0x1d   : > { %597 = vmatpush.msra.mxu2 %v580_v0  ;;  %v548_v2 = vld [vmem:[%s3717_s19 + $0x18] sm:$0xff]  ;;  %v547_v3 = vld [vmem:[%s3717_s19 + $0x10] sm:$0xff]  ;;  %v577_v5 = vld [vmem:[%s3716_s2] sm:$0xff] }
  0x1e   : > { %569 = vmatpush.msra.mxu0 %v548_v2  ;;  %v546_v6 = vld [vmem:[%s3717_s19 + $0x8] sm:$0xff]  ;;  %s2445_s30 = sshll.u32 %s541_s23, 3  ;;  %v545_v7 = vld [vmem:[%s3717_s19] sm:$0xff]  ;;  %v2461_v30 = vld [vmem:[%s3716_s2 + $0x38] sm:$0xff] }
  0x1f   : > { %598 = vmatpush.msra.mxu2 %v579_v1  ;;  %s543_s21 = scalar_lea.vmem %s3718_s18, %s2445_s30  ;;  %v2687_v9 = vld [vmem:[%s3684_s5] ss:$0 sm:$0xff]  ;;  %v608_v18 = vld [vmem:[%s3719_s3 + $0x18] sm:$0xff]  ;;  %v607_v19 = vld [vmem:[%s3719_s3 + $0x10] sm:$0xff]  ;;  %s2444_s30 = sshll.u32 %s537_s29, 3 }
  0x20   : > { %570 = vmatpush.msra.mxu0 %v547_v3  ;;  %v2999_v8 = vld [vmem:[%s543_s21] sm:$0xff]  ;;  %v606_v20 = vld [vmem:[%s3719_s3 + $0x8] sm:$0xff]  ;;  %v2460_v31 = vld [vmem:[%s3716_s2 + $0x30] sm:$0xff]  ;;  %s2376_s21 = scalar_lea.hbm %s3696_s17, %s2644_s26  ;;  %s539_s23 = scalar_lea.vmem [#allocation2], %s2444_s30 }
  0x21   : > { %599 = vmatpush.msra.mxu2 %v578_v4  ;;  %v2688_v10 = vld [vmem:[%s3683_s4] ss:$0 sm:$0xff]  ;;  %v2459_v32 = vld [vmem:[%s3716_s2 + $0x28] sm:$0xff]  ;;  %v2455_v34 = vld [vmem:[%s3717_s19 + $0x38] sm:$0xff]  ;;  %s2378_s28 = sshll.u32 %s539_s23, 4  ;;  %s2787_s30 = scalar_lea.hbm %s3696_s17, 16  ;;  %s2379_s28 = int_to_ptr.vmem [resolvable:$true] %s2378_s28 }
  0x22   : > { %571 = vmatpush.msra.mxu0 %v546_v6  ;;  %v605_v21 = vld [vmem:[%s3719_s3] sm:$0xff]  ;;  %v2454_v35 = vld [vmem:[%s3717_s19 + $0x30] sm:$0xff]  ;;  %v2467_v36 = vld [vmem:[%s3719_s3 + $0x38] sm:$0xff] }
  0x23   : > { %600 = vmatpush.msra.mxu2 %v577_v5  ;;  %v2689_v27 = vld [vmem:[%s3685_s6] ss:$0 sm:$0xff]  ;;  %v2466_v37 = vld [vmem:[%s3719_s3 + $0x30] sm:$0xff]  ;;  %v2453_v38 = vld [vmem:[%s3717_s19 + $0x28] sm:$0xff] }
  0x24   : > { %2447 = vmatmul.msk.f32.vlgmr.msra.gmra.mxu2 %vm553_vm0, %v2999_v8  ;;  %572 = vmatpush.msra.mxu0 %v545_v7  ;;  %v2458_v33 = vld [vmem:[%s3716_s2 + $0x20] sm:$0xff]  ;;  %v2465_v39 = vld [vmem:[%s3719_s3 + $0x28] sm:$0xff] }
  0x25   : > { %2446 = vmatmul.msk.f32.vlgmr.msra.gmra.mxu0 %vm553_vm0, %v2999_v8  ;;  %625 = vmatpush.msrb.mxu2 %v608_v18  ;;  %v2452_v41 = vld [vmem:[%s3717_s19 + $0x20] sm:$0xff] }
  0x26   : > { %731 = vmatpush.msrb.mxu0 %v2455_v34  ;;  %v2464_v42 = vld [vmem:[%s3719_s3 + $0x20] sm:$0xff] }
  0x27   : > { %626 = vmatpush.msrb.mxu2 %v607_v19  ;;  %v708_v54 = vld [vmem:[%s3686_s7] sm:$0xff] }
  0x28   : > { %732 = vmatpush.msrb.mxu0 %v2454_v35  ;;  %v2692_v55 = vld [vmem:[%s3685_s6 + $0x1] ss:$0 sm:$0xff] }
  0x29   : > { %627 = vmatpush.msrb.mxu2 %v606_v20  ;;  %v2690_v59 = vld [vmem:[%s3684_s5 + $0x1] ss:$0 sm:$0xff] }
  0x2a   : > { %733 = vmatpush.msrb.mxu0 %v2453_v38  ;;  %v2691_v60 = vld [vmem:[%s3683_s4 + $0x1] ss:$0 sm:$0xff] }
  0x2b   : > { %628 = vmatpush.msrb.mxu2 %v605_v21 }
  0x2c   : > { %2448 = vmatmul.msk.f32.vlgmr.msrb.gmra.mxu2 %vm553_vm0, %v2999_v8  ;;  %734 = vmatpush.msrb.mxu0 %v2452_v41 }
  0x2d   : > { %791 = vmatpush.msra.mxu2 %v2467_v36  ;;  %2457 = vmatmul.msk.f32.vlgmr.msrb.gmra.mxu0 %vm553_vm0, %v2999_v8 }
  0x2f   : > { %792 = vmatpush.msra.mxu2 %v2466_v37 }
  0x31   : > { %793 = vmatpush.msra.mxu2 %v2465_v39 }
  0x33   : > { %794 = vmatpush.msra.mxu2 %v2464_v42  ;;  %v2491_v42 = vld [vmem:[%s3719_s3 + $0x58] sm:$0xff] }
  0x34   : > { %2469 = vmatmul.msk.f32.vlgmr.msra.gmra.mxu2 %vm553_vm0, %v2999_v8 }
  0x35   : > { %916 = vmatpush.msrb.mxu2 %v708_v54 }
  0xa2   : > { %v574_v11 = vpop.f32.mrf.mxu0 }
  0xa3   : > { %v575_v14 = vadd.f32 %v2688_v10, %v574_v11  ;;  %v2479_v10 = vld [vmem:[%s3717_s19 + $0x58] sm:$0xff]  ;;  %v2478_v11 = vld [vmem:[%s3717_s19 + $0x50] sm:$0xff] }
  0xa7   : > { %v602_v12 = vpop.f32.mrf.mxu2 }
  0xa8   : > { %v603_v13 = vadd.f32 %v2687_v9, %v602_v12  ;;  %v2485_v12 = vld [vmem:[%s3716_s2 + $0x58] sm:$0xff] }
  0xaa   : > { %2449 = vmatpush.xpose.msk.msra.mxu3 %vm633_vm1, %v603_v13  ;;  %v736_v61 = vpop.f32.mrf.mxu0  ;;  %v2477_v13 = vld [vmem:[%s3717_s19 + $0x48] sm:$0xff] }
  0xab   : > { %v737_v0 = vadd.f32 %v2691_v60, %v736_v61  ;;  %v2501_v60 = vld [vmem:[%s3717_s19 + $0x70] sm:$0xff] }
  0xac   : > { %v2497_v61 = vld [vmem:[%s3686_s7 + $0x10] sm:$0xff] }
  0xad   : > { %2450 = vmatmul.msk.f32.vlgmr.msra.gmra.mxu3 %vm633_vm1, %v575_v14  ;;  %v2484_v14 = vld [vmem:[%s3716_s2 + $0x50] sm:$0xff] }
  0xaf   : > { %v630_v28 = vpop.f32.mrf.mxu2 }
  0xb0   : > { %v631_v29 = vadd.f32 %v2689_v27, %v630_v28 }
  0xb2   : > { %703 = vmatpush.msrb.mxu3 %v631_v29 }
  0xb4   : > { %761 = vmatpush.msra.mxu3 %v2461_v30  ;;  %v2473_v30 = vld [vmem:[%s3686_s7 + $0x8] sm:$0xff] }
  0xb5   : > { %893 = vmatpush.msra.mxu1 %v2473_v30 }
  0xb6   : > { %762 = vmatpush.msra.mxu3 %v2460_v31 }
  0xb7   : > { %v796_v56 = vpop.f32.mrf.mxu2  ;;  %1003 = vmatpush.msrb.mxu1 %v2491_v42 }
  0xb8   : > { %763 = vmatpush.msra.mxu3 %v2459_v32  ;;  %v797_v57 = vadd.f32 %v2692_v55, %v796_v56  ;;  %v2693_v32 = vld [vmem:[%s3684_s5 + $0x2] ss:$0 sm:$0xff]  ;;  %v2507_v56 = vld [vmem:[%s3716_s2 + $0x70] sm:$0xff] }
  0xba   : > { %764 = vmatpush.msra.mxu3 %v2458_v33  ;;  %868 = vmatpush.msra.mxu0 %v797_v57  ;;  %v2694_v33 = vld [vmem:[%s3683_s4 + $0x2] ss:$0 sm:$0xff]  ;;  %v2506_v57 = vld [vmem:[%s3716_s2 + $0x68] sm:$0xff] }
  0xbc   : > { %973 = vmatpush.msrb.mxu0 %v2485_v12 }
  0xbe   : > { %974 = vmatpush.msrb.mxu0 %v2484_v14 }
 0x130   : > { %v657_v15 = vpop.f32.mrf.mxu3 }
 0x131   : > { %v660_v16 = vmul.f32 0.35355338, %v657_v15  ;;  %v2476_v15 = vld [vmem:[%s3717_s19 + $0x40] sm:$0xff] }
 0x133   : > { %v661_v17 = vsel %vm633_vm1, %v660_v16, -inf }
 0x134   : > { %662 = vmax.xlane.f32.xlu0 %v661_v17  ;;  %v2482_v17 = vld [vmem:[%s3716_s2 + $0x40] sm:$0xff] }
 0x1a7   : > { %v663_v22 = vpop.xlane.xlu0 %662 }
 0x1a8   : > { %v664_v23 = vsub.f32 %v660_v16, %v663_v22  ;;  %v2483_v16 = vld [vmem:[%s3716_s2 + $0x48] sm:$0xff] }
 0x1a9   : > { %975 = vmatpush.msrb.mxu0 %v2483_v16 }
 0x1aa   : > { %v665_v24 = vmul.f32 1.442695, %v664_v23 }
 0x1ab   : > { %976 = vmatpush.msrb.mxu0 %v2482_v17  ;;  %v2697_v17 = vld [vmem:[%s3683_s4 + $0x3] ss:$0 sm:$0xff] }
 0x1ac   : > { %2725 = vpow2.f32 %v665_v24 }
 0x1b2   : > { %v2726_v25 = vpop.eup %2725 }
 0x1b3   : > { %v667_v26 = vsel %vm633_vm1, %v2726_v25, 0.0 }
 0x1b4   : > { %668 = vadd.xlane.f32.xlu0 %v667_v26 }
 0x227   : > { %v669_v40 = vpop.xlane.xlu0 %668 }
 0x228   : > { %2727 = vrcp.f32 %v669_v40  ;;  %v681_v46 = vand.u32 2147483648, %v669_v40  ;;  %v679_v48 = vand.u32 2147483647, %v669_v40  ;;  %vm675_vm3 = vweird.f32 %v669_v40 }
 0x22a   : > { %v682_v50 = vor.u32 1.1754944e-38, %v681_v46  ;;  %vm680_vm5 = vcmp.eq.f32.partialorder %v679_v48, 8.507059e+37 }
 0x22e   : > { %v2728_v43 = vpop.eup %2727 }
 0x22f   : > { %v671_v44 = vmul.f32 %v2728_v43, %v669_v40  ;;  %vm676_vm2 = vweird.f32 %v2728_v43 }
 0x230   : > { %vm677_vm4 = vmor %vm675_vm3, %vm676_vm2 }
 0x231   : > { %v672_v45 = vsub.f32 1.0, %v671_v44  ;;  %v2489_v44 = vld [vmem:[%s3719_s3 + $0x48] sm:$0xff] }
 0x233   : > { %v673_v47 = vmul.f32 %v2728_v43, %v672_v45  ;;  %v2488_v45 = vld [vmem:[%s3719_s3 + $0x40] sm:$0xff] }
 0x235   : > { %v674_v49 = vadd.f32 %v2728_v43, %v673_v47 }
 0x237   : > { %v678_v51 = vsel %vm677_vm4, %v2728_v43, %v674_v49  ;;  %v2490_v43 = vld [vmem:[%s3719_s3 + $0x50] sm:$0xff] }
 0x238   : > { %v683_v52 = vsel %vm680_vm5, %v682_v50, %v678_v51  ;;  %1004 = vmatpush.msrb.mxu1 %v2490_v43 }
 0x239   : > { %v684_v53 = vmul.f32 %v2726_v25, %v683_v52  ;;  %v2695_v52 = vld [vmem:[%s3685_s6 + $0x2] ss:$0 sm:$0xff] }
 0x23a   : > { %1005 = vmatpush.msrb.mxu1 %v2489_v44 }
 0x23b   : > { %2451 = vmatmul.msk.f32.vlgmr.msrb.gmra.mxu3 %vm633_vm1, %v684_v53  ;;  %v2508_v53 = vld [vmem:[%s3716_s2 + $0x78] sm:$0xff] }
 0x23c   : > { %1006 = vmatpush.msrb.mxu1 %v2488_v45 }
 0x243   : > { %2463 = vmatmul.msk.f32.vlgmr.msra.gmra.mxu3 %vm553_vm0, %v2999_v8 }
 0x2be   : > { %v705_v58 = vpop.f32.mrf.mxu3 }
 0x2bf   : > { %2475 = vmatmul.msk.f32.vlgmr.msrb.gmra.mxu2 %vm633_vm1, %v705_v58  ;;  %v2505_v58 = vld [vmem:[%s3716_s2 + $0x60] sm:$0xff] }
 0x2c6   : > { %v766_v62 = vpop.f32.mrf.mxu3 }
 0x2c7   : > { %v767_v63 = vadd.f32 %v2690_v59, %v766_v62  ;;  %v2502_v59 = vld [vmem:[%s3717_s19 + $0x78] sm:$0xff]  ;;  %v2500_v62 = vld [vmem:[%s3717_s19 + $0x68] sm:$0xff] }
 0x2c9   : > { %2470 = vmatpush.xpose.msk.msrb.mxu3 %vm633_vm1, %v767_v63  ;;  %v2499_v63 = vld [vmem:[%s3717_s19 + $0x60] sm:$0xff] }
 0x2cc   : > { %2471 = vmatmul.msk.f32.vlgmr.msrb.gmra.mxu3 %vm633_vm1, %v737_v0 }
 0x2cd   : > { %943 = vmatpush.msra.mxu3 %v2479_v10 }
 0x2cf   : > { %944 = vmatpush.msra.mxu3 %v2478_v11 }
 0x2d1   : > { %945 = vmatpush.msra.mxu3 %v2477_v13  ;;  %v2696_v13 = vld [vmem:[%s3684_s5 + $0x3] ss:$0 sm:$0xff] }
 0x2d3   : > { %946 = vmatpush.msra.mxu3 %v2476_v15 }
 0x2d4   : > { %2481 = vmatmul.msk.f32.vlgmr.msra.gmra.mxu3 %vm553_vm0, %v2999_v8 }
 0x342   : > { %v3133_v38 = vpop.f32.mrf.mxu2 }
 0x34f   : > { %v822_v1 = vpop.f32.mrf.mxu3 }
 0x350   : > { %v825_v2 = vmul.f32 0.35355338, %v822_v1 }
 0x352   : > { %v826_v3 = vsel %vm633_vm1, %v825_v2, -inf }
 0x353   : > { %827 = vmax.xlane.f32.xlu1 %v826_v3 }
 0x357   : > { %v948_v34 = vpop.f32.mrf.mxu3 }
 0x358   : > { %v949_v37 = vadd.f32 %v2694_v33, %v948_v34 }
 0x3c6   : > { %v828_v4 = vpop.xlane.xlu1 %827 }
 0x3c7   : > { %v829_v5 = vsub.f32 %v825_v2, %v828_v4 }
 0x3c9   : > { %v830_v6 = vmul.f32 1.442695, %v829_v5 }
 0x3cb   : > { %2729 = vpow2.f32 %v830_v6 }
 0x3d1   : > { %v2730_v7 = vpop.eup %2729 }
 0x3d2   : > { %v832_v9 = vsel %vm633_vm1, %v2730_v7, 0.0 }
 0x3d3   : > { %833 = vadd.xlane.f32.xlu1 %v832_v9 }
 0x446   : > { %v834_v18 = vpop.xlane.xlu1 %833 }
 0x447   : > { %2731 = vrcp.f32 %v834_v18  ;;  %v846_v22 = vand.u32 2147483648, %v834_v18  ;;  %v844_v24 = vand.u32 2147483647, %v834_v18  ;;  %vm840_vm7 = vweird.f32 %v834_v18 }
 0x449   : > { %v847_v26 = vor.u32 1.1754944e-38, %v846_v22  ;;  %vm845_vm9 = vcmp.eq.f32.partialorder %v844_v24, 8.507059e+37 }
 0x44d   : > { %v2732_v19 = vpop.eup %2731 }
 0x44e   : > { %v836_v20 = vmul.f32 %v2732_v19, %v834_v18  ;;  %vm841_vm6 = vweird.f32 %v2732_v19 }
 0x44f   : > { %vm842_vm8 = vmor %vm840_vm7, %vm841_vm6 }
 0x450   : > { %v837_v21 = vsub.f32 1.0, %v836_v20 }
 0x452   : > { %v838_v23 = vmul.f32 %v2732_v19, %v837_v21 }
 0x454   : > { %v839_v25 = vadd.f32 %v2732_v19, %v838_v23 }
 0x456   : > { %v843_v27 = vsel %vm842_vm8, %v2732_v19, %v839_v25 }
 0x457   : > { %v848_v28 = vsel %vm845_vm9, %v847_v26, %v843_v27  ;;  %v2514_v26 = vld [vmem:[%s3719_s3 + $0x78] sm:$0xff]  ;;  %v2513_v27 = vld [vmem:[%s3719_s3 + $0x70] sm:$0xff] }
 0x458   : > { %v849_v29 = vmul.f32 %v2730_v7, %v848_v28  ;;  %v2512_v28 = vld [vmem:[%s3719_s3 + $0x68] sm:$0xff] }
 0x45a   : > { %2472 = vmatmul.msk.f32.vlgmr.msra.gmra.mxu0 %vm633_vm1, %v849_v29  ;;  %v2511_v29 = vld [vmem:[%s3719_s3 + $0x60] sm:$0xff] }
 0x45b   : > { %1105 = vmatpush.msra.mxu0 %v2497_v61 }
 0x462   : > { %2487 = vmatmul.msk.f32.vlgmr.msrb.gmra.mxu0 %vm553_vm0, %v2999_v8 }
 0x4d7   : > { %v870_v31 = vpop.f32.mrf.mxu0 }
 0x4d8   : > { %2474 = vmatmul.msk.f32.vlgmr.msra.gmra.mxu1 %vm633_vm1, %v870_v31 }
 0x4d9   : > { %1133 = vmatpush.msra.mxu1 %v2502_v59 }
 0x4db   : > { %1134 = vmatpush.msra.mxu1 %v2501_v60 }
 0x4dd   : > { %1135 = vmatpush.msra.mxu1 %v2500_v62 }
 0x4df   : > { %v978_v35 = vpop.f32.mrf.mxu0  ;;  %1136 = vmatpush.msra.mxu1 %v2499_v63 }
 0x4e0   : > { %v979_v36 = vadd.f32 %v2693_v32, %v978_v35  ;;  %2493 = vmatmul.msk.f32.vlgmr.msrb.gmra.mxu1 %vm553_vm0, %v2999_v8  ;;  %v2698_v35 = vld [vmem:[%s3685_s6 + $0x3] ss:$0 sm:$0xff] }
 0x4e2   : > { %2494 = vmatpush.xpose.msk.msra.mxu2 %vm633_vm1, %v979_v36 }
 0x4e5   : > { %2495 = vmatmul.msk.f32.vlgmr.msra.gmra.mxu2 %vm633_vm1, %v949_v37 }
 0x4e6   : > { %1163 = vmatpush.msrb.mxu2 %v2508_v53 }
 0x4e8   : > { %1164 = vmatpush.msrb.mxu2 %v2507_v56  ;;  %2504 = vmatmul.msk.f32.vlgmr.msra.gmra.mxu1 %vm553_vm0, %v2999_v8 }
 0x4ea   : > { %1165 = vmatpush.msrb.mxu2 %v2506_v57 }
 0x4ec   : > { %1166 = vmatpush.msrb.mxu2 %v2505_v58  ;;  %v2831_v58 = vmov 32.0  }
 0x4ed   : > { %2510 = vmatmul.msk.f32.vlgmr.msrb.gmra.mxu2 %vm553_vm0, %v2999_v8 }
 0x555   : > { %v895_v51 = vpop.f32.mrf.mxu1 }
 0x556   : > { %v919_v20 = vadd.f32 %v3133_v38, %v895_v51  ;;  %v2520_v38 = vld [vmem:[%s3686_s7 + $0x18] sm:$0xff] }
 0x557   : > { %1295 = vmatpush.msra.mxu2 %v2520_v38  ;;  %v1380_v38 = vld [vmem:[%s3692_s13 + $0x10] sm:$0xff] }
 0x55d   : > { %v1008_v54 = vpop.f32.mrf.mxu1 }
 0x55e   : > { %v1009_v55 = vadd.f32 %v2695_v52, %v1008_v54  ;;  %v2699_v54 = vld [vmem:[%s3687_s8] ss:$0 sm:$0xff] }
 0x560   : > { %1080 = vmatpush.msrb.mxu3 %v1009_v55 }
 0x562   : > { %1193 = vmatpush.msra.mxu3 %v2514_v26  ;;  %v1383_v26 = vld [vmem:[%s3692_s13 + $0x28] sm:$0xff] }
 0x564   : > { %1194 = vmatpush.msra.mxu3 %v2513_v27 }
 0x565   : > { %v1138_v18 = vpop.f32.mrf.mxu1 }
 0x566   : > { %v1139_v19 = vadd.f32 %v2697_v17, %v1138_v18  ;;  %1195 = vmatpush.msra.mxu3 %v2512_v28  ;;  %v1389_v17 = vld [vmem:[%s3692_s13 + $0x58] sm:$0xff]  ;;  %v1388_v18 = vld [vmem:[%s3692_s13 + $0x50] sm:$0xff]  ;;  %v1382_v28 = vld [vmem:[%s3692_s13 + $0x20] sm:$0xff] }
 0x568   : > { %v1034_v39 = vpop.f32.mrf.mxu2  ;;  %1196 = vmatpush.msra.mxu3 %v2511_v29 }
 0x569   : > { %v1037_v40 = vmul.f32 0.35355338, %v1034_v39 }
 0x56b   : > { %v1038_v41 = vsel %vm633_vm1, %v1037_v40, -inf }
 0x56c   : > { %1039 = vmax.xlane.f32.xlu2 %v1038_v41 }
 0x570   : > { %v1168_v14 = vpop.f32.mrf.mxu2 }
 0x571   : > { %v1169_v15 = vadd.f32 %v2696_v13, %v1168_v14 }
 0x573   : > { %2517 = vmatpush.xpose.msk.msrb.mxu0 %vm633_vm1, %v1169_v15  ;;  %v1390_v15 = vld [vmem:[%s3692_s13 + $0x60] sm:$0xff] }
 0x5df   : > { %v1040_v46 = vpop.xlane.xlu2 %1039 }
 0x5e0   : > { %v1041_v47 = vsub.f32 %v1037_v40, %v1040_v46 }
 0x5e2   : > { %v1042_v48 = vmul.f32 1.442695, %v1041_v47 }
 0x5e4   : > { %2733 = vpow2.f32 %v1042_v48 }
 0x5ea   : > { %v2734_v49 = vpop.eup %2733 }
 0x5eb   : > { %v1044_v50 = vsel %vm633_vm1, %v2734_v49, 0.0 }
 0x5ec   : > { %1045 = vadd.xlane.f32.xlu2 %v1044_v50 }
 0x65f   : > { %v1046_v0 = vpop.xlane.xlu2 %1045 }
 0x660   : > { %2735 = vrcp.f32 %v1046_v0  ;;  %v1058_v4 = vand.u32 2147483648, %v1046_v0  ;;  %v1056_v6 = vand.u32 2147483647, %v1046_v0  ;;  %vm1052_vm11 = vweird.f32 %v1046_v0 }
 0x662   : > { %v1059_v9 = vor.u32 1.1754944e-38, %v1058_v4  ;;  %vm1057_vm13 = vcmp.eq.f32.partialorder %v1056_v6, 8.507059e+37  ;;  %v1348_v6 = vld [vmem:[%s3690_s11 + $0x10] sm:$0xff] }
 0x666   : > { %v2736_v1 = vpop.eup %2735 }
 0x667   : > { %v1048_v2 = vmul.f32 %v2736_v1, %v1046_v0  ;;  %vm1053_vm10 = vweird.f32 %v2736_v1 }
 0x668   : > { %vm1054_vm12 = vmor %vm1052_vm11, %vm1053_vm10 }
 0x669   : > { %v1049_v3 = vsub.f32 1.0, %v1048_v2 }
 0x66b   : > { %v1050_v5 = vmul.f32 %v2736_v1, %v1049_v3 }
 0x66d   : > { %v1051_v7 = vadd.f32 %v2736_v1, %v1050_v5  ;;  %v1349_v5 = vld [vmem:[%s3690_s11 + $0x18] sm:$0xff] }
 0x66f   : > { %v1055_v10 = vsel %vm1054_vm12, %v2736_v1, %v1051_v7  ;;  %v1347_v7 = vld [vmem:[%s3690_s11 + $0x8] sm:$0xff] }
 0x670   : > { %v1060_v11 = vsel %vm1057_vm13, %v1059_v9, %v1055_v10  ;;  %v1346_v9 = vld [vmem:[%s3690_s11] sm:$0xff]  ;;  %v1393_v10 = vld [vmem:[%s3692_s13 + $0x78] sm:$0xff] }
 0x671   : > { %v1061_v12 = vmul.f32 %v2734_v49, %v1060_v11  ;;  %v1392_v11 = vld [vmem:[%s3692_s13 + $0x70] sm:$0xff] }
 0x673   : > { %2496 = vmatmul.msk.f32.vlgmr.msrb.gmra.mxu3 %vm633_vm1, %v1061_v12  ;;  %v1391_v12 = vld [vmem:[%s3692_s13 + $0x68] sm:$0xff] }
 0x674   : > { %1369 = vmatpush.msrb.mxu3 %v1349_v5  ;;  %v2535_v5 = vld [vmem:[%s3719_s3 + $0x80] sm:$0xff] }
 0x676   : > { %1370 = vmatpush.msrb.mxu3 %v1348_v6  ;;  %v2569_v6 = vld [vmem:[%s3717_s19 + $0xc0] sm:$0xff] }
 0x678   : > { %1371 = vmatpush.msrb.mxu3 %v1347_v7  ;;  %v2548_v7 = vld [vmem:[%s3717_s19 + $0xb8] sm:$0xff] }
 0x67a   : > { %1372 = vmatpush.msrb.mxu3 %v1346_v9  ;;  %v2547_v9 = vld [vmem:[%s3717_s19 + $0xb0] sm:$0xff] }
 0x67b   : > { %2516 = vmatmul.msk.f32.vlgmr.msra.gmra.mxu3 %vm553_vm0, %v2999_v8 }
 0x6f6   : > { %v1082_v16 = vpop.f32.mrf.mxu3 }
 0x6f7   : > { %2498 = vmatmul.msk.f32.vlgmr.msra.gmra.mxu0 %vm633_vm1, %v1082_v16 }
 0x6f8   : > { %1398 = vmatpush.msra.mxu0 %v1393_v10 }
 0x6fa   : > { %1399 = vmatpush.msra.mxu0 %v1392_v11  ;;  %v2546_v11 = vld [vmem:[%s3717_s19 + $0xa8] sm:$0xff] }
 0x6fc   : > { %1400 = vmatpush.msra.mxu0 %v1391_v12 }
 0x6fe   : > { %v1198_v36 = vpop.f32.mrf.mxu3  ;;  %1401 = vmatpush.msra.mxu0 %v1390_v15 }
 0x6ff   : > { %2518 = vmatmul.msk.f32.vlgmr.msrb.gmra.mxu0 %vm633_vm1, %v1139_v19  ;;  %v1199_v37 = vadd.f32 %v2698_v35, %v1198_v36  ;;  %v1387_v19 = vld [vmem:[%s3692_s13 + $0x48] sm:$0xff]  ;;  %v2701_v35 = vld [vmem:[%s3689_s10] ss:$0 sm:$0xff] }
 0x700   : > { %1402 = vmatpush.msra.mxu0 %v1389_v17 }
 0x701   : > { %1270 = vmatpush.msrb.mxu1 %v1199_v37 }
 0x702   : > { %1403 = vmatpush.msra.mxu0 %v1388_v18 }
 0x704   : > { %1404 = vmatpush.msra.mxu0 %v1387_v19 }
 0x774   : > { %v1107_v21 = vpop.f32.mrf.mxu0 }
 0x775   : > { %v1110_v22 = vadd.f32 %v1107_v21, %v919_v20  ;;  %v1386_v20 = vld [vmem:[%s3692_s13 + $0x40] sm:$0xff] }
 0x776   : > { %1405 = vmatpush.msra.mxu0 %v1386_v20 }
 0x77c   : > { %v1224_v23 = vpop.f32.mrf.mxu0 }
 0x77d   : > { %v1227_v24 = vmul.f32 0.35355338, %v1224_v23 }
 0x77f   : > { %v1228_v25 = vsel %vm633_vm1, %v1227_v24, -inf }
 0x780   : > { %1229 = vmax.xlane.f32.xlu0 %v1228_v25 }
 0x7f3   : > { %v1230_v30 = vpop.xlane.xlu0 %1229 }
 0x7f4   : > { %v1231_v31 = vsub.f32 %v1227_v24, %v1230_v30  ;;  %v1384_v24 = vld [vmem:[%s3692_s13 + $0x30] sm:$0xff]  ;;  %v1381_v30 = vld [vmem:[%s3692_s13 + $0x18] sm:$0xff] }
 0x7f6   : > { %v1232_v32 = vmul.f32 1.442695, %v1231_v31 }
 0x7f8   : > { %2737 = vpow2.f32 %v1232_v32  ;;  %v2700_v32 = vld [vmem:[%s3688_s9] ss:$0 sm:$0xff] }
 0x7fe   : > { %v2738_v33 = vpop.eup %2737 }
 0x7ff   : > { %v1234_v34 = vsel %vm633_vm1, %v2738_v33, 0.0 }
 0x800   : > { %1235 = vadd.xlane.f32.xlu1 %v1234_v34 }
 0x873   : > { %v1236_v39 = vpop.xlane.xlu1 %1235 }
 0x874   : > { %2739 = vrcp.f32 %v1236_v39  ;;  %v1248_v43 = vand.u32 2147483648, %v1236_v39  ;;  %v1246_v45 = vand.u32 2147483647, %v1236_v39  ;;  %vm1242_vm15 = vweird.f32 %v1236_v39 }
 0x875   : > { %2741 = vrcp.f32 %v2831_v58  ;;  %v2572_v58 = vld [vmem:[%s3717_s19 + $0xd8] sm:$0xff] }
 0x876   : > { %v1249_v47 = vor.u32 1.1754944e-38, %v1248_v43  ;;  %vm1247_vm3 = vcmp.eq.f32.partialorder %v1246_v45, 8.507059e+37  ;;  %v2703_v45 = vld [vmem:[%s3693_s14] ss:$0 sm:$0xff] }
 0x87a   : > { %v2740_v40 = vpop.eup %2739 }
 0x87b   : > { %v1238_v41 = vmul.f32 %v2740_v40, %v1236_v39  ;;  %vm1243_vm14 = vweird.f32 %v2740_v40  ;;  %v2742_v59 = vpop.eup %2741  ;;  %v1379_v39 = vld [vmem:[%s3692_s13 + $0x8] sm:$0xff] }
 0x87c   : > { %vm1244_vm2 = vmor %vm1242_vm15, %vm1243_vm14  ;;  %v1313_v60 = vmul.f32 32.0, %v2742_v59  ;;  %vm1317_vm4 = vweird.f32 %v2742_v59 }
 0x87d   : > { %v1239_v42 = vsub.f32 1.0, %v1238_v41  ;;  %v2702_v41 = vld [vmem:[%s3691_s12] ss:$0 sm:$0xff] }
 0x87e   : > { %v1314_v61 = vsub.f32 1.0, %v1313_v60  ;;  %v2531_v60 = vld [vmem:[%s3716_s2 + $0x90] sm:$0xff] }
 0x87f   : > { %v1240_v44 = vmul.f32 %v2740_v40, %v1239_v42 }
 0x880   : > { %v1315_v62 = vmul.f32 %v2742_v59, %v1314_v61  ;;  %v2537_v61 = vld [vmem:[%s3719_s3 + $0x90] sm:$0xff] }
 0x881   : > { %v1241_v46 = vadd.f32 %v2740_v40, %v1240_v44 }
 0x882   : > { %v1316_v63 = vadd.f32 %v2742_v59, %v1315_v62  ;;  %v2571_v62 = vld [vmem:[%s3717_s19 + $0xd0] sm:$0xff] }
 0x883   : > { %v1245_v48 = vsel %vm1244_vm2, %v2740_v40, %v1241_v46  ;;  %v1378_v40 = vld [vmem:[%s3692_s13] sm:$0xff] }
 0x884   : > { %v1250_v49 = vsel %vm1247_vm3, %v1249_v47, %v1245_v48  ;;  %v3225_v0 = vsel %vm1317_vm4, %v2742_v59, %v1316_v63  ;;  %v2525_v59 = vld [vmem:[%s3717_s19 + $0x90] sm:$0xff]  ;;  %v2524_v63 = vld [vmem:[%s3717_s19 + $0x88] sm:$0xff] }
 0x885   : > { %v1251_v50 = vmul.f32 %v2738_v33, %v1250_v49 }
 0x887   : > { %2519 = vmatmul.msk.f32.vlgmr.msrb.gmra.mxu1 %vm633_vm1, %v1251_v50 }
 0x904   : > { %v1272_v51 = vpop.f32.mrf.mxu1 }
 0x905   : > { %2521 = vmatmul.msk.f32.vlgmr.msra.gmra.mxu2 %vm633_vm1, %v1272_v51 }
 0x988   : > { %v1297_v52 = vpop.f32.mrf.mxu2 }
 0x989   : > { %v1300_v53 = vadd.f32 %v1297_v52, %v1110_v22  ;;  %v1385_v22 = vld [vmem:[%s3692_s13 + $0x38] sm:$0xff] }
 0x98a   : > { %1406 = vmatpush.msra.mxu0 %v1385_v22 }
 0x98b   : > { %v1301_v55 = vadd.f32 %v1300_v53, %v2999_v8 }
 0x98c   : > { %1407 = vmatpush.msra.mxu0 %v1384_v24 }
 0x98d   : > { %v1306_v56 = vadd.f32 %v2699_v54, %v1301_v55  ;;  %v2526_v55 = vld [vmem:[%s3717_s19 + $0x98] sm:$0xff] }
 0x98e   : > { %1408 = vmatpush.msra.mxu0 %v1383_v26  ;;  %1476 = vmatpush.msra.mxu1 %v2526_v55 }
 0x98f   : > { %v1309_v57 = vsel %vm553_vm0, %v1306_v56, 0.0 }
 0x990   : > { %1310 = vadd.xlane.f32.xlu2 %v1309_v57  ;;  %1409 = vmatpush.msra.mxu0 %v1382_v28  ;;  %v2538_v57 = vld [vmem:[%s3719_s3 + $0x98] sm:$0xff]  ;;  %v2709_v28 = vld [vmem:[%s3685_s6 + $0x4] ss:$0 sm:$0xff] }
 0x991   : > { %1536 = vmatpush.msra.mxu3 %v2538_v57  ;;  %1477 = vmatpush.msra.mxu1 %v2525_v59  ;;  %v2560_v57 = vld [vmem:[%s3719_s3 + $0xb8] sm:$0xff]  ;;  %v2558_v59 = vld [vmem:[%s3719_s3 + $0xa8] sm:$0xff] }
 0x992   : > { %1410 = vmatpush.msra.mxu0 %v1381_v30 }
 0x993   : > { %1537 = vmatpush.msra.mxu3 %v2537_v61  ;;  %1478 = vmatpush.msra.mxu1 %v2524_v63 }
 0x994   : > { %1411 = vmatpush.msra.mxu0 %v1380_v38  ;;  %v2552_v38 = vld [vmem:[%s3716_s2 + $0xa8] sm:$0xff] }
 0x996   : > { %1412 = vmatpush.msra.mxu0 %v1379_v39  ;;  %v2551_v39 = vld [vmem:[%s3716_s2 + $0xa0] sm:$0xff] }
 0x998   : > { %1413 = vmatpush.msra.mxu0 %v1378_v40 }
 0x99a   : > { %1854 = vmatpush.msrb.mxu0 %v2572_v58  ;;  %v2559_v58 = vld [vmem:[%s3719_s3 + $0xb0] sm:$0xff] }
 0x99c   : > { %1855 = vmatpush.msrb.mxu0 %v2571_v62 }
 0xa03   : > { %v1311_v1 = vpop.xlane.xlu2 %1310 }
 0xa04   : > { %v1319_v2 = vmul.f32 %v3225_v0, %v1311_v1  ;;  %v2530_v1 = vld [vmem:[%s3716_s2 + $0x88] sm:$0xff] }
 0xa06   : > { %v1320_v3 = vsub.f32 %v1306_v56, %v1319_v2  ;;  %v2532_v56 = vld [vmem:[%s3716_s2 + $0x98] sm:$0xff]  ;;  %v2536_v2 = vld [vmem:[%s3719_s3 + $0x88] sm:$0xff] }
 0xa07   : > { %1506 = vmatpush.msrb.mxu2 %v2532_v56  ;;  %1538 = vmatpush.msra.mxu3 %v2536_v2 }
 0xa08   : > { %v1321_v4 = vmul.f32 %v1320_v3, %v1320_v3 }
 0xa09   : > { %1507 = vmatpush.msrb.mxu2 %v2531_v60  ;;  %1539 = vmatpush.msra.mxu3 %v2535_v5  ;;  %v2557_v60 = vld [vmem:[%s3719_s3 + $0xa0] sm:$0xff] }
 0xa0a   : > { %v1322_v8 = vsel %vm553_vm0, %v1321_v4, 0.0  ;;  %v2523_v4 = vld [vmem:[%s3717_s19 + $0x80] sm:$0xff] }
 0xa0b   : > { %1323 = vadd.xlane.f32.xlu0 %v1322_v8  ;;  %1508 = vmatpush.msrb.mxu2 %v2530_v1  ;;  %v2529_v8 = vld [vmem:[%s3716_s2 + $0x80] sm:$0xff] }
 0xa0c   : > { %1479 = vmatpush.msra.mxu1 %v2523_v4 }
 0xa0d   : > { %1509 = vmatpush.msrb.mxu2 %v2529_v8 }
 0xa7e   : > { %v1324_v13 = vpop.xlane.xlu0 %1323 }
 0xa7f   : > { %v1325_v14 = vmul.f32 %v1324_v13, %v3225_v0  ;;  %v2545_v13 = vld [vmem:[%s3717_s19 + $0xa0] sm:$0xff] }
 0xa81   : > { %v1326_v16 = vadd.f32 1e-05, %v1325_v14 }
 0xa83   : > { %2743 = vrsqrt.f32 %v1326_v16  ;;  %vm1333_vm6 = vweird.f32 %v1326_v16 }
 0xa89   : > { %v2744_v21 = vpop.eup %2743 }
 0xa8a   : > { %v1328_v23 = vmul.f32 %v2744_v21, %v1326_v16  ;;  %vm1334_vm5 = vweird.f32 %v2744_v21 }
 0xa8b   : > { %vm1335_vm7 = vmor %vm1333_vm6, %vm1334_vm5 }
 0xa8c   : > { %v1329_v25 = vmul.f32 %v2744_v21, %v1328_v23  ;;  %v2705_v23 = vld [vmem:[%s3695_s16] ss:$0 sm:$0xff] }
 0xa8e   : > { %v1330_v27 = vmul.f32 0.5, %v1329_v25 }
 0xa90   : > { %v1331_v29 = vsub.f32 1.5, %v1330_v27  ;;  %v2708_v27 = vld [vmem:[%s3684_s5 + $0x4] ss:$0 sm:$0xff] }
 0xa92   : > { %v1332_v31 = vmul.f32 %v2744_v21, %v1331_v29  ;;  %v2706_v29 = vld [vmem:[%s3683_s4 + $0x4] ss:$0 sm:$0xff] }
 0xa94   : > { %v1336_v33 = vsel %vm1335_vm7, %v2744_v21, %v1332_v31  ;;  %v2704_v21 = vld [vmem:[%s3694_s15] ss:$0 sm:$0xff] }
 0xa95   : > { %v1337_v34 = vmul.f32 %v1336_v33, %v1320_v3  ;;  %v2570_v3 = vld [vmem:[%s3717_s19 + $0xc8] sm:$0xff] }
 0xa96   : > { %1856 = vmatpush.msrb.mxu0 %v2570_v3 }
 0xa97   : > { %v1341_v36 = vmul.f32 %v2700_v32, %v1337_v34  ;;  %v2554_v34 = vld [vmem:[%s3716_s2 + $0xb8] sm:$0xff] }
 0xa98   : > { %1857 = vmatpush.msrb.mxu0 %v2569_v6 }
 0xa99   : > { %v1345_v37 = vadd.f32 %v2701_v35, %v1341_v36 }
 0xa9b   : > { %2522 = vmatmul.msk.f32.vlgmr.msrb.gmra.mxu3 %vm553_vm0, %v1345_v37 }
 0xa9c   : > { %1642 = vmatpush.msrb.mxu3 %v2548_v7 }
 0xa9e   : > { %1643 = vmatpush.msrb.mxu3 %v2547_v9 }
 0xaa0   : > { %1644 = vmatpush.msrb.mxu3 %v2546_v11 }
 0xaa2   : > { %1645 = vmatpush.msrb.mxu3 %v2545_v13 }
 0xb1e   : > { %v1374_v42 = vpop.f32.mrf.mxu3 }
 0xb1f   : > { %v1375_v43 = vadd.f32 %v2702_v41, %v1374_v42 }
 0xb21   : > { %v1377_v44 = vmax.f32 %v1375_v43, 0.0  ;;  %v2711_v43 = vld [vmem:[%s3684_s5 + $0x5] ss:$0 sm:$0xff] }
 0xb23   : > { %1414 = vmatmul.f32.vlgmr.msra.gmra.mxu0 %v1377_v44  ;;  %v2710_v44 = vld [vmem:[%s3683_s4 + $0x5] ss:$0 sm:$0xff] }
 0xba0   : > { %v1415_v46 = vpop.f32.mrf.mxu0 }
 0xba1   : > { %v1416_v47 = vadd.f32 %v2703_v45, %v1415_v46 }
 0xba3   : > { %v1418_v48 = vadd.f32 %v1416_v47, %v1345_v37  ;;  %v2553_v37 = vld [vmem:[%s3716_s2 + $0xb0] sm:$0xff] }
 0xba5   : > { %v1421_v49 = vsel %vm553_vm0, %v1418_v48, 0.0 }
 0xba6   : > { %1422 = vadd.xlane.f32.xlu1 %v1421_v49 }
 0xc19   : > { %v1423_v50 = vpop.xlane.xlu1 %1422 }
 0xc1a   : > { %v1424_v51 = vmul.f32 %v1423_v50, %v3225_v0 }
 0xc1c   : > { %v1425_v52 = vsub.f32 %v1418_v48, %v1424_v51 }
 0xc1e   : > { %v1426_v53 = vmul.f32 %v1425_v52, %v1425_v52 }
 0xc20   : > { %v1427_v54 = vsel %vm553_vm0, %v1426_v53, 0.0 }
 0xc21   : > { %1428 = vadd.xlane.f32.xlu2 %v1427_v54 }
 0xc94   : > { %v1429_v10 = vpop.xlane.xlu2 %1428 }
 0xc95   : > { %v1430_v12 = vmul.f32 %v1429_v10, %v3225_v0 }
 0xc97   : > { %v1431_v14 = vadd.f32 1e-05, %v1430_v12 }
 0xc99   : > { %2745 = vrsqrt.f32 %v1431_v14  ;;  %vm1438_vm9 = vweird.f32 %v1431_v14 }
 0xc9f   : > { %v2746_v15 = vpop.eup %2745 }
 0xca0   : > { %v1433_v16 = vmul.f32 %v2746_v15, %v1431_v14  ;;  %vm1439_vm8 = vweird.f32 %v2746_v15 }
 0xca1   : > { %vm1440_vm10 = vmor %vm1438_vm9, %vm1439_vm8 }
 0xca2   : > { %v1434_v17 = vmul.f32 %v2746_v15, %v1433_v16 }
 0xca4   : > { %v1435_v18 = vmul.f32 0.5, %v1434_v17 }
 0xca6   : > { %v1436_v19 = vsub.f32 1.5, %v1435_v18 }
 0xca8   : > { %v1437_v20 = vmul.f32 %v2746_v15, %v1436_v19 }
 0xcaa   : > { %v1441_v22 = vsel %vm1440_vm10, %v2746_v15, %v1437_v20  ;;  %v2544_v15 = vld [vmem:[%s3686_s7 + $0x20] sm:$0xff] }
 0xcab   : > { %v1442_v24 = vmul.f32 %v1441_v22, %v1425_v52  ;;  %v2712_v22 = vld [vmem:[%s3685_s6 + $0x5] ss:$0 sm:$0xff] }
 0xcad   : > { %v1446_v25 = vmul.f32 %v2704_v21, %v1442_v24 }
 0xcaf   : > { %v3373_v26 = vadd.f32 %v2705_v23, %v1446_v25 }
 0xcb1   : > { %2528 = vmatmul.msk.f32.vlgmr.msra.gmra.mxu1 %vm553_vm0, %v3373_v26  ;;  %2534 = vmatmul.msk.f32.vlgmr.msrb.gmra.mxu2 %vm553_vm0, %v3373_v26 }
 0xcb2   : > { %2540 = vmatmul.msk.f32.vlgmr.msra.gmra.mxu3 %vm553_vm0, %v3373_v26  ;;  %2574 = vmatmul.msk.f32.vlgmr.msrb.gmra.mxu0 %vm553_vm0, %v3373_v26 }
 0xcba   : > { %2550 = vmatmul.msk.f32.vlgmr.msrb.gmra.mxu3 %vm553_vm0, %v3373_v26 }
 0xd2e   : > { %v1481_v31 = vpop.f32.mrf.mxu1 }
 0xd2f   : > { %v1482_v36 = vadd.f32 %v2706_v29, %v1481_v31 }
 0xd34   : > { %v1511_v30 = vpop.f32.mrf.mxu2 }
 0xd35   : > { %v1512_v32 = vadd.f32 %v2708_v27, %v1511_v30  ;;  %v1541_v33 = vpop.f32.mrf.mxu3  ;;  %v2578_v30 = vld [vmem:[%s3716_s2 + $0xd8] sm:$0xff] }
 0xd36   : > { %v1542_v35 = vadd.f32 %v2709_v28, %v1541_v33 }
 0xd37   : > { %2541 = vmatpush.xpose.msk.msrb.mxu1 %vm633_vm1, %v1512_v32 }
 0xd38   : > { %1613 = vmatpush.msra.mxu2 %v1542_v35  ;;  %v2576_v35 = vld [vmem:[%s3716_s2 + $0xc8] sm:$0xff] }
 0xd3a   : > { %2542 = vmatmul.msk.f32.vlgmr.msrb.gmra.mxu1 %vm633_vm1, %v1482_v36  ;;  %1702 = vmatpush.msrb.mxu2 %v2560_v57  ;;  %v2575_v36 = vld [vmem:[%s3716_s2 + $0xc0] sm:$0xff]  ;;  %v2590_v57 = vld [vmem:[%s3686_s7 + $0x30] sm:$0xff] }
 0xd3b   : > { %1672 = vmatpush.msra.mxu1 %v2554_v34  ;;  %v2577_v34 = vld [vmem:[%s3716_s2 + $0xd0] sm:$0xff] }
 0xd3c   : > { %1703 = vmatpush.msrb.mxu2 %v2559_v58 }
 0xd3d   : > { %1673 = vmatpush.msra.mxu1 %v2553_v37  ;;  %v1647_v46 = vpop.f32.mrf.mxu3  ;;  %v2566_v37 = vld [vmem:[%s3686_s7 + $0x28] sm:$0xff] }
 0xd3e   : > { %v1648_v48 = vadd.f32 %v2710_v44, %v1647_v46  ;;  %1704 = vmatpush.msrb.mxu2 %v2558_v59  ;;  %v2594_v44 = vld [vmem:[%s3717_s19 + $0xf0] sm:$0xff]  ;;  %v2713_v46 = vld [vmem:[%s3684_s5 + $0x6] ss:$0 sm:$0xff] }
 0xd3f   : > { %1674 = vmatpush.msra.mxu1 %v2552_v38  ;;  %v2584_v38 = vld [vmem:[%s3719_s3 + $0xd8] sm:$0xff] }
 0xd40   : > { %1705 = vmatpush.msrb.mxu2 %v2557_v60 }
 0xd41   : > { %1675 = vmatpush.msra.mxu1 %v2551_v39  ;;  %v2583_v39 = vld [vmem:[%s3719_s3 + $0xd0] sm:$0xff] }
 0xd42   : > { %2556 = vmatmul.msk.f32.vlgmr.msra.gmra.mxu1 %vm553_vm0, %v3373_v26 }
 0xdb7   : > { %v1567_v40 = vpop.f32.mrf.mxu1 }
 0xdb8   : > { %v1570_v41 = vmul.f32 0.35355338, %v1567_v40  ;;  %v2582_v40 = vld [vmem:[%s3719_s3 + $0xc8] sm:$0xff] }
 0xdba   : > { %v1571_v42 = vsel %vm633_vm1, %v1570_v41, -inf }
 0xdbb   : > { %1572 = vmax.xlane.f32.xlu0 %v1571_v42  ;;  %v2595_v42 = vld [vmem:[%s3717_s19 + $0xf8] sm:$0xff] }
 0xdbf   : > { %v1677_v45 = vpop.f32.mrf.mxu1 }
 0xdc0   : > { %v1678_v47 = vadd.f32 %v2711_v43, %v1677_v45  ;;  %v2593_v45 = vld [vmem:[%s3717_s19 + $0xe8] sm:$0xff] }
 0xdc2   : > { %2563 = vmatpush.xpose.msk.msra.mxu3 %vm633_vm1, %v1678_v47  ;;  %v2592_v47 = vld [vmem:[%s3717_s19 + $0xe0] sm:$0xff] }
 0xdc5   : > { %2564 = vmatmul.msk.f32.vlgmr.msra.gmra.mxu3 %vm633_vm1, %v1648_v48  ;;  %v2707_v48 = vld [vmem:[%s3683_s4 + $0x6] ss:$0 sm:$0xff] }
 0xdc6   : > { %1827 = vmatpush.msrb.mxu3 %v2544_v15  ;;  %v2604_v15 = vld [vmem:[%s3719_s3 + $0xe0] sm:$0xff] }
 0xe2e   : > { %v1573_v49 = vpop.xlane.xlu0 %1572 }
 0xe2f   : > { %v1574_v50 = vsub.f32 %v1570_v41, %v1573_v49  ;;  %v2581_v41 = vld [vmem:[%s3719_s3 + $0xc0] sm:$0xff] }
 0xe31   : > { %v1575_v51 = vmul.f32 1.442695, %v1574_v50  ;;  %v1859_v50 = vpop.f32.mrf.mxu0 }
 0xe33   : > { %2747 = vpow2.f32 %v1575_v51 }
 0xe39   : > { %v2748_v52 = vpop.eup %2747 }
 0xe3a   : > { %v1577_v53 = vsel %vm633_vm1, %v2748_v52, 0.0 }
 0xe3b   : > { %1578 = vadd.xlane.f32.xlu1 %v1577_v53  ;;  %v1860_v53 = vadd.f32 %v2707_v48, %v1859_v50 }
 0xe48   : > { %v1733_v54 = vpop.f32.mrf.mxu3 }
 0xe49   : > { %v1736_v55 = vmul.f32 0.35355338, %v1733_v54  ;;  %v2600_v54 = vld [vmem:[%s3716_s2 + $0xf0] sm:$0xff] }
 0xe4b   : > { %v1737_v56 = vsel %vm633_vm1, %v1736_v55, -inf }
 0xe4c   : > { %1738 = vmax.xlane.f32.xlu2 %v1737_v56  ;;  %v2598_v56 = vld [vmem:[%s3716_s2 + $0xe0] sm:$0xff] }
 0xeae   : > { %v1579_v61 = vpop.xlane.xlu1 %1578 }
 0xeaf   : > { %2749 = vrcp.f32 %v1579_v61  ;;  %v1591_v2 = vand.u32 2147483648, %v1579_v61  ;;  %v1589_v4 = vand.u32 2147483647, %v1579_v61  ;;  %vm1585_vm12 = vweird.f32 %v1579_v61 }
 0xeb1   : > { %v1592_v5 = vor.u32 1.1754944e-38, %v1591_v2  ;;  %vm1590_vm14 = vcmp.eq.f32.partialorder %v1589_v4, 8.507059e+37  ;;  %v2716_v4 = vld [vmem:[%s3684_s5 + $0x7] ss:$0 sm:$0xff] }
 0xeb5   : > { %v2750_v62 = vpop.eup %2749 }
 0xeb6   : > { %v1581_v63 = vmul.f32 %v2750_v62, %v1579_v61  ;;  %vm1586_vm11 = vweird.f32 %v2750_v62  ;;  %v2714_v61 = vld [vmem:[%s3685_s6 + $0x6] ss:$0 sm:$0xff] }
 0xeb7   : > { %vm1587_vm13 = vmor %vm1585_vm12, %vm1586_vm11 }
 0xeb8   : > { %v1582_v1 = vsub.f32 1.0, %v1581_v63 }
 0xeba   : > { %v1583_v3 = vmul.f32 %v2750_v62, %v1582_v1 }
 0xebc   : > { %v1584_v8 = vadd.f32 %v2750_v62, %v1583_v3 }
 0xebe   : > { %v1588_v6 = vsel %vm1587_vm13, %v2750_v62, %v1584_v8 }
 0xebf   : > { %v1593_v7 = vsel %vm1590_vm14, %v1592_v5, %v1588_v6  ;;  %v1739_v9 = vpop.xlane.xlu2 %1738 }
 0xec0   : > { %v1740_v10 = vsub.f32 %v1736_v55, %v1739_v9  ;;  %v1594_v11 = vmul.f32 %v2748_v52, %v1593_v7  ;;  %v2601_v52 = vld [vmem:[%s3716_s2 + $0xf8] sm:$0xff]  ;;  %v2599_v55 = vld [vmem:[%s3716_s2 + $0xe8] sm:$0xff]  ;;  %s2380_s2 = sshll.u32 %s2376_s21, 4  ;;  %s2381_s2 = int_to_ptr.hbm [resolvable:$true] %s2380_s2 }
 0xec1   : > { %s2781_s24 = sshra.s32 %s2381_s2, 4  ;;  %s2782_s24 = int_to_ptr.hbm [resolvable:$true] %s2781_s24 }
 0xec2   : > { %v1741_v12 = vmul.f32 1.442695, %v1740_v10  ;;  %2543 = vmatmul.msk.f32.vlgmr.msra.gmra.mxu2 %vm633_vm1, %v1594_v11  ;;  %s2783_s26 = scalar_lea.hbm %s2782_s24, 8  ;;  %p2788_p0 = scmp.lt.s32.totalorder %s2782_s24, %s3696_s17 }
 0xec3   : > { %1804 = vmatpush.msra.mxu2 %v2566_v37  ;;  %p2784_p11 = scmp.ne.s32.totalorder %s2782_s24, %s2783_s26  ;;  %p2789_p1 = scmp.lt.s32.totalorder %s2787_s30, %s2783_s26 }
 0xec4   : > { %2751 = vpow2.f32 %v1741_v12  ;;  %v2607_v12 = vld [vmem:[%s3719_s3 + $0xf8] sm:$0xff] }
 0xec5   : > { %p2785_p12 = pnand %p2784_p11, %p2960_p5  ;;  %p2790_p2 = por %p2789_p1, %p2788_p0 }
 0xec7   : > { %p2786_p13 = pneg %p2785_p12 }
 0xec9   : > { %p2791_p3 = pnand %p2790_p2, %p2786_p13 }
 0xeca   : > { %v2752_v13 = vpop.eup %2751  ;;  %2562 = vmatmul.msk.f32.vlgmr.msrb.gmra.mxu2 %vm553_vm0, %v3373_v26 }
 0xecb   : > { %v1743_v14 = vsel %vm633_vm1, %v2752_v13, 0.0  ;;  %1914 = vmatpush.msrb.mxu2 %v2584_v38 }
 0xecc   : > { %1744 = vadd.xlane.f32.xlu0 %v1743_v14  ;;  %v2605_v14 = vld [vmem:[%s3719_s3 + $0xe8] sm:$0xff] }
 0xecd   : > { %1915 = vmatpush.msrb.mxu2 %v2583_v39 }
 0xecf   : > { %1916 = vmatpush.msrb.mxu2 %v2582_v40 }
 0xed1   : > { %1917 = vmatpush.msrb.mxu2 %v2581_v41 }
 0xf3f   : > { %v1745_v16 = vpop.xlane.xlu0 %1744 }
 0xf40   : > { %2753 = vrcp.f32 %v1745_v16  ;;  %v1757_v21 = vand.u32 2147483648, %v1745_v16  ;;  %v1755_v24 = vand.u32 2147483647, %v1745_v16  ;;  %vm1751_vm2 = vweird.f32 %v1745_v16 }
 0xf42   : > { %v1758_v28 = vor.u32 1.1754944e-38, %v1757_v21  ;;  %vm1756_vm4 = vcmp.eq.f32.partialorder %v1755_v24, 8.507059e+37 }
 0xf45   : > { %v1615_v17 = vpop.f32.mrf.mxu2 }
 0xf46   : > { %v2754_v18 = vpop.eup %2753  ;;  %2568 = vmatmul.msk.f32.vlgmr.msrb.gmra.mxu3 %vm633_vm1, %v1615_v17 }
 0xf47   : > { %v1747_v19 = vmul.f32 %v2754_v18, %v1745_v16  ;;  %vm1752_vm15 = vweird.f32 %v2754_v18 }
 0xf48   : > { %vm1753_vm3 = vmor %vm1751_vm2, %vm1752_vm15 }
 0xf49   : > { %v1748_v20 = vsub.f32 1.0, %v1747_v19 }
 0xf4b   : > { %v1749_v23 = vmul.f32 %v2754_v18, %v1748_v20 }
 0xf4d   : > { %v1750_v25 = vadd.f32 %v2754_v18, %v1749_v23  ;;  %v1707_v27 = vpop.f32.mrf.mxu2 }
 0xf4e   : > { %v1708_v29 = vadd.f32 %v2712_v22, %v1707_v27 }
 0xf4f   : > { %v1754_v31 = vsel %vm1753_vm3, %v2754_v18, %v1750_v25 }
 0xf50   : > { %v1759_v32 = vsel %vm1756_vm4, %v1758_v28, %v1754_v31  ;;  %1779 = vmatpush.msrb.mxu1 %v1708_v29 }
 0xf51   : > { %v1760_v33 = vmul.f32 %v2752_v13, %v1759_v32  ;;  %v2606_v13 = vld [vmem:[%s3719_s3 + $0xf0] sm:$0xff]  ;;  %v2717_v32 = vld [vmem:[%s3685_s6 + $0x7] ss:$0 sm:$0xff] }
 0xf52   : > { %1884 = vmatpush.msra.mxu1 %v2578_v30  ;;  %v2715_v30 = vld [vmem:[%s3683_s4 + $0x7] ss:$0 sm:$0xff] }
 0xf53   : > { %2565 = vmatmul.msk.f32.vlgmr.msrb.gmra.mxu1 %vm633_vm1, %v1760_v33 }
 0xf54   : > { %1885 = vmatpush.msra.mxu1 %v2577_v34 }
 0xf56   : > { %1886 = vmatpush.msra.mxu1 %v2576_v35 }
 0xf58   : > { %1887 = vmatpush.msra.mxu1 %v2575_v36 }
 0xf5a   : > { %2016 = vmatpush.msrb.mxu1 %v2590_v57 }
 0xf5b   : > { %2580 = vmatmul.msk.f32.vlgmr.msra.gmra.mxu1 %vm553_vm0, %v3373_v26 }
 0xfc9   : > { %v1829_v58 = vpop.f32.mrf.mxu3 }
 0xfd0   : > { %v1781_v43 = vpop.f32.mrf.mxu1 }
 0xfd1   : > { %2567 = vmatmul.msk.f32.vlgmr.msra.gmra.mxu2 %vm633_vm1, %v1781_v43 }
 0xfd2   : > { %2044 = vmatpush.msra.mxu2 %v2595_v42 }
 0xfd4   : > { %2045 = vmatpush.msra.mxu2 %v2594_v44 }
 0xfd6   : > { %2046 = vmatpush.msra.mxu2 %v2593_v45 }
 0xfd8   : > { %v1889_v49 = vpop.f32.mrf.mxu1  ;;  %2047 = vmatpush.msra.mxu2 %v2592_v47 }
 0xfd9   : > { %v1890_v51 = vadd.f32 %v2713_v46, %v1889_v49  ;;  %2586 = vmatmul.msk.f32.vlgmr.msrb.gmra.mxu2 %vm553_vm0, %v3373_v26  ;;  %v2613_v46 = vld [vmem:[%s3686_s7 + $0x38] sm:$0xff] }
 0xfdb   : > { %2587 = vmatpush.xpose.msk.msra.mxu3 %vm633_vm1, %v1890_v51 }
 0xfde   : > { %2588 = vmatmul.msk.f32.vlgmr.msra.gmra.mxu3 %vm633_vm1, %v1860_v53 }
 0xfdf   : > { %2074 = vmatpush.msrb.mxu3 %v2601_v52 }
 0xfe1   : > { %2075 = vmatpush.msrb.mxu3 %v2600_v54  ;;  %2597 = vmatmul.msk.f32.vlgmr.msra.gmra.mxu2 %vm553_vm0, %v3373_v26 }
 0xfe3   : > { %2076 = vmatpush.msrb.mxu3 %v2599_v55 }
 0xfe5   : > { %2077 = vmatpush.msrb.mxu3 %v2598_v56 }
 0xfe6   : > { %2603 = vmatmul.msk.f32.vlgmr.msrb.gmra.mxu3 %vm553_vm0, %v3373_v26 }
 0xfe7   : > { %2206 = vmatpush.msra.mxu3 %v2613_v46 }
0x1054   : > { %v1806_v59 = vpop.f32.mrf.mxu2 }
0x1055   : > { %v1830_v60 = vadd.f32 %v1829_v58, %v1806_v59 }
0x105c   : > { %v1919_v62 = vpop.f32.mrf.mxu2 }
0x105d   : > { %v1920_v63 = vadd.f32 %v2714_v61, %v1919_v62  ;;  %v2718_v62 = vld [vmem:[%s3687_s8 + $0x1] ss:$0 sm:$0xff] }
0x105f   : > { %1991 = vmatpush.msra.mxu0 %v1920_v63 }
0x1061   : > { %v1945_v1 = vpop.f32.mrf.mxu3  ;;  %2104 = vmatpush.msrb.mxu0 %v2607_v12  ;;  %v2638_v12 = vld [vmem:[%s3692_s13 + $0xf0] sm:$0xff] }
0x1062   : > { %v1948_v2 = vmul.f32 0.35355338, %v1945_v1 }
0x1063   : > { %2105 = vmatpush.msrb.mxu0 %v2606_v13  ;;  %v2637_v13 = vld [vmem:[%s3692_s13 + $0xe8] sm:$0xff] }
0x1064   : > { %v1949_v3 = vsel %vm633_vm1, %v1948_v2, -inf  ;;  %v2049_v31 = vpop.f32.mrf.mxu2 }
0x1065   : > { %1950 = vmax.xlane.f32.xlu1 %v1949_v3  ;;  %2106 = vmatpush.msrb.mxu0 %v2605_v14  ;;  %v2050_v33 = vadd.f32 %v2715_v30, %v2049_v31  ;;  %v2628_v30 = vld [vmem:[%s3692_s13 + $0xa0] sm:$0xff] }
0x1067   : > { %2107 = vmatpush.msrb.mxu0 %v2604_v15 }
0x1069   : > { %v2079_v8 = vpop.f32.mrf.mxu3 }
0x106a   : > { %v2080_v5 = vadd.f32 %v2716_v4, %v2079_v8 }
0x106c   : > { %2610 = vmatpush.xpose.msk.msra.mxu1 %vm633_vm1, %v2080_v5 }
0x10d8   : > { %v1951_v6 = vpop.xlane.xlu1 %1950 }
0x10d9   : > { %v1952_v7 = vsub.f32 %v1948_v2, %v1951_v6 }
0x10db   : > { %v1953_v9 = vmul.f32 1.442695, %v1952_v7  ;;  %v2621_v7 = vld [vmem:[%s3690_s11 + $0x38] sm:$0xff] }
0x10dd   : > { %2755 = vpow2.f32 %v1953_v9  ;;  %v2619_v9 = vld [vmem:[%s3690_s11 + $0x28] sm:$0xff] }
0x10e3   : > { %v2756_v10 = vpop.eup %2755 }
0x10e4   : > { %v1955_v11 = vsel %vm633_vm1, %v2756_v10, 0.0 }
0x10e5   : > { %1956 = vadd.xlane.f32.xlu2 %v1955_v11  ;;  %v2639_v11 = vld [vmem:[%s3692_s13 + $0xf8] sm:$0xff] }
0x1158   : > { %v1957_v16 = vpop.xlane.xlu2 %1956 }
0x1159   : > { %2757 = vrcp.f32 %v1957_v16  ;;  %v1969_v20 = vand.u32 2147483648, %v1957_v16  ;;  %v1967_v22 = vand.u32 2147483647, %v1957_v16  ;;  %vm1963_vm6 = vweird.f32 %v1957_v16 }
0x115b   : > { %v1970_v24 = vor.u32 1.1754944e-38, %v1969_v20  ;;  %vm1968_vm8 = vcmp.eq.f32.partialorder %v1967_v22, 8.507059e+37  ;;  %v2633_v20 = vld [vmem:[%s3692_s13 + $0xc8] sm:$0xff] }
0x115f   : > { %v2758_v17 = vpop.eup %2757 }
0x1160   : > { %v1959_v18 = vmul.f32 %v2758_v17, %v1957_v16  ;;  %vm1964_vm5 = vweird.f32 %v2758_v17  ;;  %v2636_v16 = vld [vmem:[%s3692_s13 + $0xe0] sm:$0xff] }
0x1161   : > { %vm1965_vm7 = vmor %vm1963_vm6, %vm1964_vm5 }
0x1162   : > { %v1960_v19 = vsub.f32 1.0, %v1959_v18  ;;  %v2635_v18 = vld [vmem:[%s3692_s13 + $0xd8] sm:$0xff] }
0x1164   : > { %v1961_v21 = vmul.f32 %v2758_v17, %v1960_v19  ;;  %v2634_v19 = vld [vmem:[%s3692_s13 + $0xd0] sm:$0xff] }
0x1166   : > { %v1962_v23 = vadd.f32 %v2758_v17, %v1961_v21  ;;  %v2632_v21 = vld [vmem:[%s3692_s13 + $0xc0] sm:$0xff] }
0x1168   : > { %v1966_v25 = vsel %vm1965_vm7, %v2758_v17, %v1962_v23  ;;  %v2631_v23 = vld [vmem:[%s3692_s13 + $0xb8] sm:$0xff] }
0x1169   : > { %v1971_v27 = vsel %vm1968_vm8, %v1970_v24, %v1966_v25  ;;  %v2630_v25 = vld [vmem:[%s3692_s13 + $0xb0] sm:$0xff] }
0x116a   : > { %v1972_v28 = vmul.f32 %v2756_v10, %v1971_v27  ;;  %v2618_v10 = vld [vmem:[%s3690_s11 + $0x20] sm:$0xff] }
0x116c   : > { %2589 = vmatmul.msk.f32.vlgmr.msra.gmra.mxu0 %vm633_vm1, %v1972_v28  ;;  %v2629_v28 = vld [vmem:[%s3692_s13 + $0xa8] sm:$0xff] }
0x116d   : > { %2278 = vmatpush.msra.mxu0 %v2621_v7 }
0x1174   : > { %2609 = vmatmul.msk.f32.vlgmr.msrb.gmra.mxu0 %vm553_vm0, %v3373_v26 }
0x11e9   : > { %v1993_v29 = vpop.f32.mrf.mxu0 }
0x11ea   : > { %2591 = vmatmul.msk.f32.vlgmr.msrb.gmra.mxu1 %vm633_vm1, %v1993_v29 }
0x11eb   : > { %2309 = vmatpush.msrb.mxu1 %v2639_v11 }
0x11ed   : > { %2310 = vmatpush.msrb.mxu1 %v2638_v12 }
0x11ef   : > { %2311 = vmatpush.msrb.mxu1 %v2637_v13 }
0x11f1   : > { %v2109_v34 = vpop.f32.mrf.mxu0  ;;  %2312 = vmatpush.msrb.mxu1 %v2636_v16 }
0x11f2   : > { %v2110_v35 = vadd.f32 %v2717_v32, %v2109_v34  ;;  %2611 = vmatmul.msk.f32.vlgmr.msra.gmra.mxu1 %vm633_vm1, %v2050_v33  ;;  %v2627_v32 = vld [vmem:[%s3692_s13 + $0x98] sm:$0xff]  ;;  %v2719_v34 = vld [vmem:[%s3688_s9 + $0x1] ss:$0 sm:$0xff] }
0x11f3   : > { %2313 = vmatpush.msrb.mxu1 %v2635_v18 }
0x11f4   : > { %2181 = vmatpush.msrb.mxu2 %v2110_v35 }
0x11f5   : > { %2314 = vmatpush.msrb.mxu1 %v2634_v19 }
0x11f7   : > { %2315 = vmatpush.msrb.mxu1 %v2633_v20 }
0x11f9   : > { %2316 = vmatpush.msrb.mxu1 %v2632_v21 }
0x11fb   : > { %2317 = vmatpush.msrb.mxu1 %v2631_v23 }
0x11fd   : > { %2318 = vmatpush.msrb.mxu1 %v2630_v25 }
0x11ff   : > { %2319 = vmatpush.msrb.mxu1 %v2629_v28 }
0x1201   : > { %2320 = vmatpush.msrb.mxu1 %v2628_v30 }
0x1203   : > { %2321 = vmatpush.msrb.mxu1 %v2627_v32 }
0x1267   : > { %v2018_v36 = vpop.f32.mrf.mxu1 }
0x1268   : > { %v2021_v37 = vadd.f32 %v2018_v36, %v1830_v60 }
0x126f   : > { %v2135_v38 = vpop.f32.mrf.mxu1 }
0x1270   : > { %v2138_v39 = vmul.f32 0.35355338, %v2135_v38 }
0x1272   : > { %v2139_v40 = vsel %vm633_vm1, %v2138_v39, -inf }
0x1273   : > { %2140 = vmax.xlane.f32.xlu0 %v2139_v40  ;;  %v2626_v40 = vld [vmem:[%s3692_s13 + $0x90] sm:$0xff] }
0x1274   : > { %2322 = vmatpush.msrb.mxu1 %v2626_v40 }
0x12e6   : > { %v2141_v41 = vpop.xlane.xlu0 %2140 }
0x12e7   : > { %v2142_v42 = vsub.f32 %v2138_v39, %v2141_v41  ;;  %v2625_v41 = vld [vmem:[%s3692_s13 + $0x88] sm:$0xff] }
0x12e8   : > { %2323 = vmatpush.msrb.mxu1 %v2625_v41 }
0x12e9   : > { %v2143_v43 = vmul.f32 1.442695, %v2142_v42  ;;  %v2624_v42 = vld [vmem:[%s3692_s13 + $0x80] sm:$0xff] }
0x12ea   : > { %2324 = vmatpush.msrb.mxu1 %v2624_v42 }
0x12eb   : > { %2759 = vpow2.f32 %v2143_v43  ;;  %v2721_v43 = vld [vmem:[%s3691_s12 + $0x1] ss:$0 sm:$0xff] }
0x12f1   : > { %v2760_v44 = vpop.eup %2759 }
0x12f2   : > { %v2145_v45 = vsel %vm633_vm1, %v2760_v44, 0.0 }
0x12f3   : > { %2146 = vadd.xlane.f32.xlu1 %v2145_v45 }
0x1366   : > { %v2147_v47 = vpop.xlane.xlu1 %2146 }
0x1367   : > { %2761 = vrcp.f32 %v2147_v47  ;;  %v2159_v51 = vand.u32 2147483648, %v2147_v47  ;;  %v2157_v53 = vand.u32 2147483647, %v2147_v47  ;;  %vm2153_vm10 = vweird.f32 %v2147_v47 }
0x1369   : > { %v2160_v55 = vor.u32 1.1754944e-38, %v2159_v51  ;;  %vm2158_vm12 = vcmp.eq.f32.partialorder %v2157_v53, 8.507059e+37 }
0x136d   : > { %v2762_v48 = vpop.eup %2761 }
0x136e   : > { %v2149_v49 = vmul.f32 %v2762_v48, %v2147_v47  ;;  %vm2154_vm9 = vweird.f32 %v2762_v48  ;;  %v2722_v47 = vld [vmem:[%s3693_s14 + $0x1] ss:$0 sm:$0xff] }
0x136f   : > { %vm2155_vm11 = vmor %vm2153_vm10, %vm2154_vm9 }
0x1370   : > { %v2150_v50 = vsub.f32 1.0, %v2149_v49 }
0x1372   : > { %v2151_v52 = vmul.f32 %v2762_v48, %v2150_v50 }
0x1374   : > { %v2152_v54 = vadd.f32 %v2762_v48, %v2151_v52 }
0x1376   : > { %v2156_v56 = vsel %vm2155_vm11, %v2762_v48, %v2152_v54 }
0x1377   : > { %v2161_v57 = vsel %vm2158_vm12, %v2160_v55, %v2156_v56 }
0x1378   : > { %v2162_v58 = vmul.f32 %v2760_v44, %v2161_v57 }
0x137a   : > { %2612 = vmatmul.msk.f32.vlgmr.msrb.gmra.mxu2 %vm633_vm1, %v2162_v58 }
0x13fd   : > { %v2183_v59 = vpop.f32.mrf.mxu2 }
0x13fe   : > { %2614 = vmatmul.msk.f32.vlgmr.msra.gmra.mxu3 %vm633_vm1, %v2183_v59 }
0x1481   : > { %v2208_v60 = vpop.f32.mrf.mxu3 }
0x1482   : > { %v2211_v61 = vadd.f32 %v2208_v60, %v2021_v37  ;;  %v2720_v37 = vld [vmem:[%s3689_s10 + $0x1] ss:$0 sm:$0xff] }
0x1484   : > { %v2212_v63 = vadd.f32 %v2211_v61, %v3373_v26  ;;  %v2620_v26 = vld [vmem:[%s3690_s11 + $0x30] sm:$0xff] }
0x1485   : > { %2279 = vmatpush.msra.mxu0 %v2620_v26 }
0x1486   : > { %v2218_v1 = vadd.f32 %v2718_v62, %v2212_v63 }
0x1487   : > { %2280 = vmatpush.msra.mxu0 %v2619_v9 }
0x1488   : > { %v2223_v2 = vsel %vm553_vm0, %v2218_v1, 0.0 }
0x1489   : > { %2224 = vadd.xlane.f32.xlu2 %v2223_v2  ;;  %2281 = vmatpush.msra.mxu0 %v2618_v10 }
0x14fc   : > { %v2225_v3 = vpop.xlane.xlu2 %2224 }
0x14fd   : > { %v2226_v4 = vmul.f32 %v2225_v3, %v3225_v0  ;;  %v2723_v3 = vld [vmem:[%s3694_s15 + $0x1] ss:$0 sm:$0xff] }
0x14ff   : > { %v2227_v8 = vsub.f32 %v2218_v1, %v2226_v4 }
0x1501   : > { %v2228_v5 = vmul.f32 %v2227_v8, %v2227_v8 }
0x1503   : > { %v2229_v6 = vsel %vm553_vm0, %v2228_v5, 0.0 }
0x1504   : > { %2230 = vadd.xlane.f32.xlu0 %v2229_v6 }
0x1577   : > { %v2231_v14 = vpop.xlane.xlu0 %2230 }
0x1578   : > { %v2232_v15 = vmul.f32 %v2231_v14, %v3225_v0 }
0x157a   : > { %v2233_v17 = vadd.f32 1e-05, %v2232_v15 }
0x157c   : > { %2763 = vrsqrt.f32 %v2233_v17  ;;  %vm2240_vm13 = vweird.f32 %v2233_v17 }
0x1582   : > { %v2764_v22 = vpop.eup %2763 }
0x1583   : > { %v2235_v24 = vmul.f32 %v2764_v22, %v2233_v17  ;;  %vm2241_vm1 = vweird.f32 %v2764_v22 }
0x1584   : > { %vm2242_vm14 = vmor %vm2240_vm13, %vm2241_vm1 }
0x1585   : > { %v2236_v27 = vmul.f32 %v2764_v22, %v2235_v24 }
0x1587   : > { %v2237_v29 = vmul.f32 0.5, %v2236_v27 }
0x1589   : > { %v2238_v31 = vsub.f32 1.5, %v2237_v29 }
0x158b   : > { %v2239_v33 = vmul.f32 %v2764_v22, %v2238_v31 }
0x158d   : > { %v2243_v35 = vsel %vm2242_vm14, %v2764_v22, %v2239_v33 }
0x158e   : > { %v2244_v36 = vmul.f32 %v2243_v35, %v2227_v8  ;;  %v2724_v8 = vld [vmem:[%s3695_s16 + $0x1] ss:$0 sm:$0xff] }
0x1590   : > { %v2248_v38 = vmul.f32 %v2719_v34, %v2244_v36 }
0x1592   : > { %v2252_v39 = vadd.f32 %v2720_v37, %v2248_v38 }
0x1594   : > { %2623 = vmatmul.msk.f32.vlgmr.msra.gmra.mxu0 %vm553_vm0, %v2252_v39 }
0x1611   : > { %v2283_v44 = vpop.f32.mrf.mxu0 }
0x1612   : > { %v2284_v45 = vadd.f32 %v2721_v43, %v2283_v44 }
0x1614   : > { %v2286_v46 = vmax.f32 %v2284_v45, 0.0 }
0x1616   : > { %2325 = vmatmul.f32.vlgmr.msrb.gmra.mxu1 %v2286_v46 }
0x1693   : > { %v2326_v48 = vpop.f32.mrf.mxu1 }
0x1694   : > { %v2327_v49 = vadd.f32 %v2722_v47, %v2326_v48 }
0x1696   : > { %v2329_v50 = vadd.f32 %v2327_v49, %v2252_v39 }
0x1698   : > { %v2334_v51 = vsel %vm553_vm0, %v2329_v50, 0.0 }
0x1699   : > { %2335 = vadd.xlane.f32.xlu1 %v2334_v51 }
0x170c   : > { %v2336_v52 = vpop.xlane.xlu1 %2335 }
0x170d   : > { %v2337_v53 = vmul.f32 %v2336_v52, %v3225_v0 }
0x170f   : > { %v2338_v54 = vsub.f32 %v2329_v50, %v2337_v53 }
0x1711   : > { %v2339_v55 = vmul.f32 %v2338_v54, %v2338_v54 }
0x1713   : > { %v2340_v56 = vsel %vm553_vm0, %v2339_v55, 0.0 }
0x1714   : > { %2341 = vadd.xlane.f32.xlu2 %v2340_v56 }
0x1787   : > { %v2342_v57 = vpop.xlane.xlu2 %2341 }
0x1788   : > { %v2343_v58 = vmul.f32 %v2342_v57, %v3225_v0 }
0x178a   : > { %v2344_v59 = vadd.f32 1e-05, %v2343_v58 }
0x178c   : > { %2765 = vrsqrt.f32 %v2344_v59  ;;  %vm2351_vm2 = vweird.f32 %v2344_v59 }
0x1792   : > { %v2766_v60 = vpop.eup %2765 }
0x1793   : > { %v2346_v61 = vmul.f32 %v2766_v60, %v2344_v59  ;;  %vm2352_vm15 = vweird.f32 %v2766_v60 }
0x1794   : > { %vm2353_vm3 = vmor %vm2351_vm2, %vm2352_vm15 }
0x1795   : > { %v2347_v62 = vmul.f32 %v2766_v60, %v2346_v61 }
0x1797   : > { %v2348_v63 = vmul.f32 0.5, %v2347_v62 }
0x1799   : > { %v2349_v1 = vsub.f32 1.5, %v2348_v63 }
0x179b   : > { %v2350_v2 = vmul.f32 %v2766_v60, %v2349_v1 }
0x179d   : > { %v2354_v0 = vsel %vm2353_vm3, %v2766_v60, %v2350_v2 }
0x179e   : > { %v2355_v4 = vmul.f32 %v2354_v0, %v2338_v54 }
0x17a0   : > { %v2359_v5 = vmul.f32 %v2723_v3, %v2355_v4 }
0x17a2   : > { %v2363_v6 = vadd.f32 %v2724_v8, %v2359_v5 }
0x17a4   : > { %2364 = vst.msk [vmem:[%s539_s23] sm:$0xff] %vm553_vm0, %v2363_v6 }
0x17a5   : > { %2794 = shalt.err (!%p2791_p3)
}
0x17a6   : > { %2647 = dma.vmem_to_hbm [thread:$0]  (%p2960_p5), %s2379_s28, 128, %s2381_s2, %s2366_s0  }
0x17a7 PF: > { %s3720_s29 = sld [smem:[#allocation7_spill]] }
0x17a8   : > { %s3721_s22 = sld [smem:[#allocation5_spill]] }
0x17ad   : > { %p2653_p4 = scmp.ge.s32.totalorder %s3720_s29, 2 }
0x17ae   : > { %s2392_s3 = sand.u32 1, %s3721_s22  }
0x17af   : > { %p2650_p7 = pnand %p2653_p4, %p2964_p6  ;;  %s2393_s20 = scalar_lea.sflag [#allocation3], %s2392_s3 }
0x17b1   : > { %p2651_p8 = pneg %p2650_p7 }
0x17b3   : > { %2812 = dma.done.wait (%p2651_p8), %s2393_s20, 128  }
0x17b4   : > { %2814 = vsyncadd (%p2651_p8), %s2393_s20, 4294967168  ;;  %s3723_s27 = sld [smem:[#allocation8_spill]]  ;;  %s3726_s24 = smov %s2821_s25 }
0x17b5   : > { %s3724_s26 = sld [smem:[#allocation6_spill]] }
0x17b6   : > { %s3725_s18 = sld [smem:[#allocation9_spill]] }
0x17ba   : > { %p27_p9 = scmp.ge.s32.totalorder %s3723_s27, 4  }
0x17bb   : > { %s3727_s25 = smov %s3724_s26 }
0x17bc   : > { %s3728_s26 = smov %s3725_s18  ;;  %29 = sbr.rel (!%p27_p9) target bundleno = 8 (0x8), region = 181 }
0x17c1   :  { %2399 = vsyncpa [#allocation3], 1 }
0x17c2   :  { %2401 = vsyncpa [#allocation3 + $0x1], 1 }

</bundles_post_ra>
